<compile_context>
chip_gen: v6e
topology: v6e:2x2x1
jax: 0.10.0
libtpu: 0.0.40
codegen_flags: <defaults>
</compile_context>

<pallas_src>
import functools

import jax
import jax.numpy as jnp
from jax.experimental import pallas as pl
from jax.experimental.pallas import tpu as pltpu

MXU_DTYPE = jnp.bfloat16   # MXU inputs; accumulation / bias / activation stay f32.


# ---------------------------------------------------------------------------
# Pallas kernel: fused (weights @ patches) + bias + activation, lane axis = M
# ---------------------------------------------------------------------------
def _gemm_bias_act_kernel(w_ref, x_ref, b_ref, o_ref, *, activation):
    """o = act(w @ x + b);  w:(R,K)  x:(K,tile_m)  b:(R,1)  o:(R,tile_m)."""
    acc = jnp.dot(w_ref[...], x_ref[...], preferred_element_type=jnp.float32)
    acc = acc + b_ref[...]                       # (R,1) broadcasts along lanes
    if activation == "relu":
        acc = jnp.maximum(acc, 0.0)
    elif activation == "sigmoid":
        acc = jax.nn.sigmoid(acc)
    o_ref[...] = acc.astype(o_ref.dtype)


def fused_gemm_bias_act(w_t, patches, bias_col, activation, out_dtype):
    """act(w_t @ patches + bias_col) with M (columns) on the lane axis."""
    R, K = w_t.shape
    K2, M = patches.shape
    assert K == K2
    # 1 or 2 column blocks: minimal grid-step overhead while still letting
    # v7x's two TensorCores split the larger layers (M is a multiple of 256).
    grid_n = 2 if M % 256 == 0 else 1
    tile_m = M // grid_n
    return pl.pallas_call(
        functools.partial(_gemm_bias_act_kernel, activation=activation),
        out_shape=jax.ShapeDtypeStruct((R, M), out_dtype),
        grid_spec=pltpu.PrefetchScalarGridSpec(
            num_scalar_prefetch=0,
            grid=(grid_n,),
            in_specs=[
                pl.BlockSpec((R, K), lambda i: (0, 0)),       # folded weights
                pl.BlockSpec((K, tile_m), lambda i: (0, i)),  # patch column block
                pl.BlockSpec((R, 1), lambda i: (0, 0)),       # bias column
            ],
            out_specs=pl.BlockSpec((R, tile_m), lambda i: (0, i)),
        ),
        compiler_params=pltpu.CompilerParams(
            dimension_semantics=("parallel",)),
    )(w_t, patches, bias_col)


# ---------------------------------------------------------------------------
# Sub-pixel decomposition of a stride-2 ConvTranspose2d
# ---------------------------------------------------------------------------
def _phase_taps(k, p, parity):
    """Kernel taps that hit output rows oy = 2*m + parity.

    Returns [(kh, d)] with contributing input row iy = m + d.
    """
    taps = []
    for kh in range(k):
        if (parity + p - kh) % 2 == 0:
            taps.append((kh, (parity + p - kh) // 2))
    return taps


def prepare_layer(w, b, k, p, output_padding):
    """Fold a stride-2 ConvTranspose2d into a single sub-pixel GEMM weight.

    w: (Cin, Cout, k, k)  (PyTorch ConvTranspose2d layout),  b: (Cout,).
    Row ph*Cout+co of W_T produces output phase ph = 2*py+px, channel co.
    """
    assert k + output_padding - 2 * p == 2, "layer must double H and W (stride 2)"
    Cin, Cout = int(w.shape[0]), int(w.shape[1])
    taps = (_phase_taps(k, p, 0), _phase_taps(k, p, 1))
    offs = sorted({d for pr in (0, 1) for _, d in taps[pr]})
    d_min, d_max = offs[0], offs[-1]
    S = d_max - d_min + 1                 # shift-neighborhood: 2 (k=3) or 3 (k=5)

    w_t = jnp.zeros((4 * Cout, S * S * Cin), jnp.float32)
    for py in range(2):
        for px in range(2):
            ph = py * 2 + px
            for khy, dy in taps[py]:
                for khx, dx in taps[px]:
                    t = (dy - d_min) * S + (dx - d_min)
                    blk = jnp.transpose(w[:, :, khy, khx])      # (Cout, Cin)
                    w_t = w_t.at[ph * Cout:(ph + 1) * Cout,
                                 t * Cin:(t + 1) * Cin].set(blk)
    bias_col = jnp.tile(b.astype(jnp.float32), 4).reshape(4 * Cout, 1)
    meta = dict(Cout=Cout, S=S, d_min=d_min,
                pad_b=max(0, -d_min), pad_a=max(0, d_max))
    return w_t.astype(MXU_DTYPE), bias_col, meta


def tconv2x_layer(x_cnhw, w_t, bias_col, meta, activation, out_dtype):
    """Stride-2 ConvTranspose2d + activation.  (Cin,N,H,W) -> (Cout,N,2H,2W)."""
    Cin, N, H, W = x_cnhw.shape
    Cout, S = meta["Cout"], meta["S"]
    pb, pa, d_min = meta["pad_b"], meta["pad_a"], meta["d_min"]
    M = N * H * W

    xp = jnp.pad(x_cnhw, ((0, 0), (0, 0), (pb, pa), (pb, pa)))
    # S*S shifted views of the *un-dilated* input, each flattened to (Cin, M).
    # TODO(synk): this small shift-stack and the phase re-interleave below stay
    # as (tiny, <1.2 MB) XLA glue; the strided pixel-shuffle interleave has no
    # clean lane-friendly in-kernel formulation, so full-decoder VMEM fusion is
    # left as a further step.
    cols = []
    for ty in range(S):
        for tx in range(S):
            sy = ty + d_min + pb
            sx = tx + d_min + pb
            cols.append(xp[:, :, sy:sy + H, sx:sx + W].reshape(Cin, M))
    patches = jnp.concatenate(cols, axis=0).astype(MXU_DTYPE)   # (S*S*Cin, M)

    out = fused_gemm_bias_act(w_t, patches, bias_col, activation, out_dtype)

    # Pixel-shuffle the 4 phases back to full resolution (cheap: <=128 KB).
    out = out.reshape(2, 2, Cout, N, H, W)
    out = out.transpose(2, 3, 4, 0, 5, 1).reshape(Cout, N, 2 * H, 2 * W)
    return out


# ---------------------------------------------------------------------------
# FeatureDecoder forward
# ---------------------------------------------------------------------------
_LAYER_CFGS = (
    # (kernel, padding, output_padding, activation)
    (3, 1, 1, "relu"),
    (3, 1, 1, "relu"),
    (3, 1, 1, "relu"),
    (5, 2, 1, "sigmoid"),
)


def make_feature_decoder(params):
    prepared = []
    for (w, b), (k, p, op, act) in zip(params, _LAYER_CFGS):
        prepared.append(prepare_layer(w, b, k, p, op) + (act,))

    def forward(x_nchw):
        x = jnp.transpose(x_nchw, (1, 0, 2, 3)).astype(MXU_DTYPE)   # (C,N,H,W)
        for i, (w_t, bias_col, meta, act) in enumerate(prepared):
            last = i == len(prepared) - 1
            x = tconv2x_layer(x, w_t, bias_col, meta, act,
                              out_dtype=jnp.float32 if last else MXU_DTYPE)
        return jnp.transpose(x, (1, 0, 2, 3))                       # NCHW f32

    return jax.jit(forward)


def init_params(key):
    def tconv(k, cin, cout, ksz):
        k1, k2 = jax.random.split(k)
        bound = 1.0 / float(cin * ksz * ksz) ** 0.5
        w = jax.random.uniform(k1, (cin, cout, ksz, ksz), jnp.float32, -bound, bound)
        b = jax.random.uniform(k2, (cout,), jnp.float32, -bound, bound)
        return w, b

    ks = jax.random.split(key, 4)
    return (
        tconv(ks[0], 64, 64, 3),
        tconv(ks[1], 64, 32, 3),
        tconv(ks[2], 32, 16, 3),
        tconv(ks[3], 16, 3, 5),
    )


# Pure-JAX / XLA f32 reference for a correctness cross-check of the Pallas path.
def _ref_conv_transpose(x, w, b, stride, padding, output_padding):
    k = w.shape[2]
    w_conv = jnp.flip(w, (2, 3)).transpose(1, 0, 2, 3)
    out = jax.lax.conv_general_dilated(
        x, w_conv, window_strides=(1, 1),
        padding=[(k - 1 - padding, k - 1 - padding + output_padding)] * 2,
        lhs_dilation=(stride, stride),
        dimension_numbers=("NCHW", "OIHW", "NCHW"))
    return out + b[None, :, None, None]


def _ref_decoder(x, params):
    (w1, b1), (w2, b2), (w3, b3), (w4, b4) = params
    x = jnp.maximum(_ref_conv_transpose(x, w1, b1, 2, 1, 1), 0.0)
    x = jnp.maximum(_ref_conv_transpose(x, w2, b2, 2, 1, 1), 0.0)
    x = jnp.maximum(_ref_conv_transpose(x, w3, b3, 2, 1, 1), 0.0)
    x = jax.nn.sigmoid(_ref_conv_transpose(x, w4, b4, 2, 2, 1))
    return x


if __name__ == "__main__":
    key = jax.random.PRNGKey(0)
    kx, kp = jax.random.split(key)
    params = init_params(kp)

    # batch=2, channels=64 (required by t_conv1), spatial 4x4 -> output 64x64
    x = jax.random.normal(kx, (2, 64, 4, 4), jnp.float32)

    decoder = make_feature_decoder(params)
    out = jax.block_until_ready(decoder(x))
    assert out.shape == (2, 3, 64, 64), out.shape

    ref = jax.block_until_ready(_ref_decoder(x, params))
    # bf16 MXU inputs (f32 accumulation) -> loosened tolerance vs the f32 XLA ref.
    max_err = float(jnp.max(jnp.abs(out - ref)))
    assert max_err < 2e-2, max_err

    print("KERNEL_OK")
</pallas_src>

<mosaic_0001>
module attributes {stable_mosaic.version = 11 : i64} {
  func.func @_gemm_bias_act_kernel(%arg0: i32, %arg1: memref<256x256xbf16, #tpu.memory_space<vmem>>, %arg2: memref<256x32xbf16, #tpu.memory_space<vmem>>, %arg3: memref<256x1xf32, #tpu.memory_space<vmem>>, %arg4: memref<256x32xbf16, #tpu.memory_space<vmem>>) attributes {dimension_semantics = [#tpu.dimension_semantics<parallel>], iteration_bounds = array<i64: 1>, scalar_prefetch = 0 : i64, scratch_operands = 0 : i64, tpu.core_type = #tpu.core_type<tc>, window_params = [{pipeline_mode = #tpu.pipeline_mode<synchronous>, transform_indices = @transform_0, window_bounds = array<i64: 256, 256>}, {transform_indices = @transform_1, window_bounds = array<i64: 256, 32>}, {pipeline_mode = #tpu.pipeline_mode<synchronous>, transform_indices = @transform_2, window_bounds = array<i64: 256, 1>}, {transform_indices = @transform_3, window_bounds = array<i64: 256, 32>}]} {
    %c0 = arith.constant 0 : index
    %c0_0 = arith.constant 0 : index
    %0 = vector.load %arg1[%c0, %c0_0] : memref<256x256xbf16, #tpu.memory_space<vmem>>, vector<256x256xbf16>
    %c0_1 = arith.constant 0 : index
    %c0_2 = arith.constant 0 : index
    %1 = vector.load %arg2[%c0_1, %c0_2] : memref<256x32xbf16, #tpu.memory_space<vmem>>, vector<256x32xbf16>
    %cst = arith.constant dense<0.000000e+00> : vector<256x32xf32>
    %2 = tpu.matmul %0, %1, %cst {dimension_numbers = #tpu.dot_dimension_numbers<[1], [0], [0], [1], [0, 0, 1, 1], [], []>} : vector<256x256xbf16>, vector<256x32xbf16>, vector<256x32xf32> -> vector<256x32xf32>
    %c0_3 = arith.constant 0 : index
    %c0_4 = arith.constant 0 : index
    %3 = vector.load %arg3[%c0_3, %c0_4] : memref<256x1xf32, #tpu.memory_space<vmem>>, vector<256x1xf32>
    %4 = vector.broadcast %3 : vector<256x1xf32> to vector<256x32xf32>
    %5 = arith.addf %2, %4 : vector<256x32xf32>
    %cst_5 = arith.constant 0.000000e+00 : f32
    %6 = vector.broadcast %cst_5 : f32 to vector<256x32xf32>
    %7 = arith.maximumf %5, %6 : vector<256x32xf32>
    %8 = arith.truncf %7 : vector<256x32xf32> to vector<256x32xbf16>
    %c0_6 = arith.constant 0 : index
    %c0_7 = arith.constant 0 : index
    %9 = vector.load %arg4[%c0_6, %c0_7] : memref<256x32xbf16, #tpu.memory_space<vmem>>, vector<256x32xbf16>
    tpu.vector_store %arg4[%c0_6, %c0_7], %8 {strides = array<i32>} : memref<256x32xbf16, #tpu.memory_space<vmem>>, vector<256x32xbf16>,
    return
  }
  func.func @transform_0(%arg0: i32) -> (i32, i32) {
    %c0_i32 = arith.constant 0 : i32
    %c0_i32_0 = arith.constant 0 : i32
    %c0_i32_1 = arith.constant 0 : i32
    return %c0_i32, %c0_i32_0 : i32, i32
  }
  func.func @transform_1(%arg0: i32) -> (i32, i32) {
    %c0_i32 = arith.constant 0 : i32
    %c0_i32_0 = arith.constant 0 : i32
    return %c0_i32, %arg0 : i32, i32
  }
  func.func @transform_2(%arg0: i32) -> (i32, i32) {
    %c0_i32 = arith.constant 0 : i32
    %c0_i32_0 = arith.constant 0 : i32
    %c0_i32_1 = arith.constant 0 : i32
    return %c0_i32, %c0_i32_0 : i32, i32
  }
  func.func @transform_3(%arg0: i32) -> (i32, i32) {
    %c0_i32 = arith.constant 0 : i32
    %c0_i32_0 = arith.constant 0 : i32
    return %c0_i32, %arg0 : i32, i32
  }
}

module attributes {stable_mosaic.version = 11 : i64} {
  func.func @_gemm_bias_act_kernel(%arg0: i32, %arg1: memref<128x256xbf16, #tpu.memory_space<vmem>>, %arg2: memref<256x128xbf16, #tpu.memory_space<vmem>>, %arg3: memref<128x1xf32, #tpu.memory_space<vmem>>, %arg4: memref<128x128xbf16, #tpu.memory_space<vmem>>) attributes {dimension_semantics = [#tpu.dimension_semantics<parallel>], iteration_bounds = array<i64: 1>, scalar_prefetch = 0 : i64, scratch_operands = 0 : i64, tpu.core_type = #tpu.core_type<tc>, window_params = [{pipeline_mode = #tpu.pipeline_mode<synchronous>, transform_indices = @transform_0, window_bounds = array<i64: 128, 256>}, {transform_indices = @transform_1, window_bounds = array<i64: 256, 128>}, {pipeline_mode = #tpu.pipeline_mode<synchronous>, transform_indices = @transform_2, window_bounds = array<i64: 128, 1>}, {transform_indices = @transform_3, window_bounds = array<i64: 128, 128>}]} {
    %c0 = arith.constant 0 : index
    %c0_0 = arith.constant 0 : index
    %0 = vector.load %arg1[%c0, %c0_0] : memref<128x256xbf16, #tpu.memory_space<vmem>>, vector<128x256xbf16>
    %c0_1 = arith.constant 0 : index
    %c0_2 = arith.constant 0 : index
    %1 = vector.load %arg2[%c0_1, %c0_2] : memref<256x128xbf16, #tpu.memory_space<vmem>>, vector<256x128xbf16>
    %cst = arith.constant dense<0.000000e+00> : vector<128x128xf32>
    %2 = tpu.matmul %0, %1, %cst {dimension_numbers = #tpu.dot_dimension_numbers<[1], [0], [0], [1], [0, 0, 1, 1], [], []>} : vector<128x256xbf16>, vector<256x128xbf16>, vector<128x128xf32> -> vector<128x128xf32>
    %c0_3 = arith.constant 0 : index
    %c0_4 = arith.constant 0 : index
    %3 = vector.load %arg3[%c0_3, %c0_4] : memref<128x1xf32, #tpu.memory_space<vmem>>, vector<128x1xf32>
    %4 = vector.broadcast %3 : vector<128x1xf32> to vector<128x128xf32>
    %5 = arith.addf %2, %4 : vector<128x128xf32>
    %cst_5 = arith.constant 0.000000e+00 : f32
    %6 = vector.broadcast %cst_5 : f32 to vector<128x128xf32>
    %7 = arith.maximumf %5, %6 : vector<128x128xf32>
    %8 = arith.truncf %7 : vector<128x128xf32> to vector<128x128xbf16>
    %c0_6 = arith.constant 0 : index
    %c0_7 = arith.constant 0 : index
    %9 = vector.load %arg4[%c0_6, %c0_7] : memref<128x128xbf16, #tpu.memory_space<vmem>>, vector<128x128xbf16>
    tpu.vector_store %arg4[%c0_6, %c0_7], %8 {strides = array<i32>} : memref<128x128xbf16, #tpu.memory_space<vmem>>, vector<128x128xbf16>,
    return
  }
  func.func @transform_0(%arg0: i32) -> (i32, i32) {
    %c0_i32 = arith.constant 0 : i32
    %c0_i32_0 = arith.constant 0 : i32
    %c0_i32_1 = arith.constant 0 : i32
    return %c0_i32, %c0_i32_0 : i32, i32
  }
  func.func @transform_1(%arg0: i32) -> (i32, i32) {
    %c0_i32 = arith.constant 0 : i32
    %c0_i32_0 = arith.constant 0 : i32
    return %c0_i32, %arg0 : i32, i32
  }
  func.func @transform_2(%arg0: i32) -> (i32, i32) {
    %c0_i32 = arith.constant 0 : i32
    %c0_i32_0 = arith.constant 0 : i32
    %c0_i32_1 = arith.constant 0 : i32
    return %c0_i32, %c0_i32_0 : i32, i32
  }
  func.func @transform_3(%arg0: i32) -> (i32, i32) {
    %c0_i32 = arith.constant 0 : i32
    %c0_i32_0 = arith.constant 0 : i32
    return %c0_i32, %arg0 : i32, i32
  }
}

module attributes {stable_mosaic.version = 11 : i64} {
  func.func @_gemm_bias_act_kernel(%arg0: i32, %arg1: memref<64x128xbf16, #tpu.memory_space<vmem>>, %arg2: memref<128x256xbf16, #tpu.memory_space<vmem>>, %arg3: memref<64x1xf32, #tpu.memory_space<vmem>>, %arg4: memref<64x256xbf16, #tpu.memory_space<vmem>>) attributes {dimension_semantics = [#tpu.dimension_semantics<parallel>], iteration_bounds = array<i64: 2>, scalar_prefetch = 0 : i64, scratch_operands = 0 : i64, tpu.core_type = #tpu.core_type<tc>, window_params = [{pipeline_mode = #tpu.pipeline_mode<synchronous>, transform_indices = @transform_0, window_bounds = array<i64: 64, 128>}, {transform_indices = @transform_1, window_bounds = array<i64: 128, 256>}, {pipeline_mode = #tpu.pipeline_mode<synchronous>, transform_indices = @transform_2, window_bounds = array<i64: 64, 1>}, {transform_indices = @transform_3, window_bounds = array<i64: 64, 256>}]} {
    %c0 = arith.constant 0 : index
    %c0_0 = arith.constant 0 : index
    %0 = vector.load %arg1[%c0, %c0_0] : memref<64x128xbf16, #tpu.memory_space<vmem>>, vector<64x128xbf16>
    %c0_1 = arith.constant 0 : index
    %c0_2 = arith.constant 0 : index
    %1 = vector.load %arg2[%c0_1, %c0_2] : memref<128x256xbf16, #tpu.memory_space<vmem>>, vector<128x256xbf16>
    %cst = arith.constant dense<0.000000e+00> : vector<64x256xf32>
    %2 = tpu.matmul %0, %1, %cst {dimension_numbers = #tpu.dot_dimension_numbers<[1], [0], [0], [1], [0, 0, 1, 1], [], []>} : vector<64x128xbf16>, vector<128x256xbf16>, vector<64x256xf32> -> vector<64x256xf32>
    %c0_3 = arith.constant 0 : index
    %c0_4 = arith.constant 0 : index
    %3 = vector.load %arg3[%c0_3, %c0_4] : memref<64x1xf32, #tpu.memory_space<vmem>>, vector<64x1xf32>
    %4 = vector.broadcast %3 : vector<64x1xf32> to vector<64x256xf32>
    %5 = arith.addf %2, %4 : vector<64x256xf32>
    %cst_5 = arith.constant 0.000000e+00 : f32
    %6 = vector.broadcast %cst_5 : f32 to vector<64x256xf32>
    %7 = arith.maximumf %5, %6 : vector<64x256xf32>
    %8 = arith.truncf %7 : vector<64x256xf32> to vector<64x256xbf16>
    %c0_6 = arith.constant 0 : index
    %c0_7 = arith.constant 0 : index
    %9 = vector.load %arg4[%c0_6, %c0_7] : memref<64x256xbf16, #tpu.memory_space<vmem>>, vector<64x256xbf16>
    tpu.vector_store %arg4[%c0_6, %c0_7], %8 {strides = array<i32>} : memref<64x256xbf16, #tpu.memory_space<vmem>>, vector<64x256xbf16>,
    return
  }
  func.func @transform_0(%arg0: i32) -> (i32, i32) {
    %c0_i32 = arith.constant 0 : i32
    %c0_i32_0 = arith.constant 0 : i32
    %c0_i32_1 = arith.constant 0 : i32
    return %c0_i32, %c0_i32_0 : i32, i32
  }
  func.func @transform_1(%arg0: i32) -> (i32, i32) {
    %c0_i32 = arith.constant 0 : i32
    %c0_i32_0 = arith.constant 0 : i32
    return %c0_i32, %arg0 : i32, i32
  }
  func.func @transform_2(%arg0: i32) -> (i32, i32) {
    %c0_i32 = arith.constant 0 : i32
    %c0_i32_0 = arith.constant 0 : i32
    %c0_i32_1 = arith.constant 0 : i32
    return %c0_i32, %c0_i32_0 : i32, i32
  }
  func.func @transform_3(%arg0: i32) -> (i32, i32) {
    %c0_i32 = arith.constant 0 : i32
    %c0_i32_0 = arith.constant 0 : i32
    return %c0_i32, %arg0 : i32, i32
  }
}

module attributes {stable_mosaic.version = 11 : i64} {
  func.func @_gemm_bias_act_kernel(%arg0: i32, %arg1: memref<12x144xbf16, #tpu.memory_space<vmem>>, %arg2: memref<144x1024xbf16, #tpu.memory_space<vmem>>, %arg3: memref<12x1xf32, #tpu.memory_space<vmem>>, %arg4: memref<12x1024xf32, #tpu.memory_space<vmem>>) attributes {dimension_semantics = [#tpu.dimension_semantics<parallel>], iteration_bounds = array<i64: 2>, scalar_prefetch = 0 : i64, scratch_operands = 0 : i64, tpu.core_type = #tpu.core_type<tc>, window_params = [{pipeline_mode = #tpu.pipeline_mode<synchronous>, transform_indices = @transform_0, window_bounds = array<i64: 12, 144>}, {transform_indices = @transform_1, window_bounds = array<i64: 144, 1024>}, {pipeline_mode = #tpu.pipeline_mode<synchronous>, transform_indices = @transform_2, window_bounds = array<i64: 12, 1>}, {transform_indices = @transform_3, window_bounds = array<i64: 12, 1024>}]} {
    %c0 = arith.constant 0 : index
    %c0_0 = arith.constant 0 : index
    %0 = vector.load %arg1[%c0, %c0_0] : memref<12x144xbf16, #tpu.memory_space<vmem>>, vector<12x144xbf16>
    %c0_1 = arith.constant 0 : index
    %c0_2 = arith.constant 0 : index
    %1 = vector.load %arg2[%c0_1, %c0_2] : memref<144x1024xbf16, #tpu.memory_space<vmem>>, vector<144x1024xbf16>
    %cst = arith.constant dense<0.000000e+00> : vector<12x1024xf32>
    %2 = tpu.matmul %0, %1, %cst {dimension_numbers = #tpu.dot_dimension_numbers<[1], [0], [0], [1], [0, 0, 1, 1], [], []>} : vector<12x144xbf16>, vector<144x1024xbf16>, vector<12x1024xf32> -> vector<12x1024xf32>
    %c0_3 = arith.constant 0 : index
    %c0_4 = arith.constant 0 : index
    %3 = vector.load %arg3[%c0_3, %c0_4] : memref<12x1xf32, #tpu.memory_space<vmem>>, vector<12x1xf32>
    %4 = vector.broadcast %3 : vector<12x1xf32> to vector<12x1024xf32>
    %5 = arith.addf %2, %4 : vector<12x1024xf32>
    %6 = arith.negf %5 : vector<12x1024xf32>
    %7 = math.exp %6 : vector<12x1024xf32>
    %cst_5 = arith.constant 1.000000e+00 : f32
    %8 = vector.broadcast %cst_5 : f32 to vector<12x1024xf32>
    %9 = arith.addf %8, %7 : vector<12x1024xf32>
    %10 = arith.divf %8, %9 : vector<12x1024xf32>
    %c0_6 = arith.constant 0 : index
    %c0_7 = arith.constant 0 : index
    %11 = vector.load %arg4[%c0_6, %c0_7] : memref<12x1024xf32, #tpu.memory_space<vmem>>, vector<12x1024xf32>
    tpu.vector_store %arg4[%c0_6, %c0_7], %10 {strides = array<i32>} : memref<12x1024xf32, #tpu.memory_space<vmem>>, vector<12x1024xf32>,
    return
  }
  func.func @transform_0(%arg0: i32) -> (i32, i32) {
    %c0_i32 = arith.constant 0 : i32
    %c0_i32_0 = arith.constant 0 : i32
    %c0_i32_1 = arith.constant 0 : i32
    return %c0_i32, %c0_i32_0 : i32, i32
  }
  func.func @transform_1(%arg0: i32) -> (i32, i32) {
    %c0_i32 = arith.constant 0 : i32
    %c0_i32_0 = arith.constant 0 : i32
    return %c0_i32, %arg0 : i32, i32
  }
  func.func @transform_2(%arg0: i32) -> (i32, i32) {
    %c0_i32 = arith.constant 0 : i32
    %c0_i32_0 = arith.constant 0 : i32
    %c0_i32_1 = arith.constant 0 : i32
    return %c0_i32, %c0_i32_0 : i32, i32
  }
  func.func @transform_3(%arg0: i32) -> (i32, i32) {
    %c0_i32 = arith.constant 0 : i32
    %c0_i32_0 = arith.constant 0 : i32
    return %c0_i32, %arg0 : i32, i32
  }
}

</mosaic_0001>

<bundles_post_ra>
// kernel: forward.5
= control target key start
LH: loop header
LB: loop body
LE: loop exit
PB: predicated region body
PF: predicated region fallthrough
CT: control target
= control target key end

     0   :  { %8 = vsyncpa [#allocation3], 0  ;;  %s959_s0 = inlined_call_operand.hbm [shape: bf16[128,256], index: 0, kind: input, shape index: {}]   ;;  %s960_s1 = inlined_call_operand.vmem [shape: bf16[256,128], index: 1, kind: input, shape index: {}]   ;;  %s961_s2 = inlined_call_operand.hbm [shape: f32[128,1], index: 2, kind: input, shape index: {}]   ;;  %s962_s3 = inlined_call_operand.vmem [shape: bf16[128,128], index: 3, kind: output, shape index: {}]  }
   0x1   :  { %9 = vsyncpa [#allocation5], 0  ;;  %s844_s12 = smov [#allocation2]  }
   0x2   :  { %s15_s13 = sshll.u32 %s844_s12, 4  ;;  %s16_s13 = int_to_ptr.vmem [resolvable:$true] %s15_s13 }
   0x3   :  { %s808_s14 = scalar_lea.vmem %s16_s13, 2048  ;;  %p813_p1 = scmp.lt.s32.totalorder %s16_s13, %s16_s13 }
   0x4   :  { %p809_p0 = scmp.ne.s32.totalorder %s16_s13, %s808_s14  ;;  %p814_p2 = scmp.lt.s32.totalorder %s808_s14, %s808_s14 }
   0x6   :  { %p815_p3 = por %p814_p2, %p813_p1 }
   0x8   :  { %p816_p4 = pnand %p815_p3, %p809_p0 }
   0xa   :  { %819 = shalt.err (!%p816_p4)
}
   0xb   :  { %s845_s15 = smov 128   ;;  %s846_s16 = smov 8  }
   0xc   :  { %21 = dma.hbm_to_vmem [thread:$0]  %s959_s0, 2048, %s16_s13, [#allocation3], %s845_s15, %s845_s15, %s846_s16  }
   0xd   :  { %s847_s19 = smov [#allocation4]  }
   0xe   :  { %s29_s20 = sshll.u32 %s847_s19, 4  ;;  %s30_s20 = int_to_ptr.vmem [resolvable:$true] %s29_s20 }
   0xf   :  { %s828_s21 = scalar_lea.vmem %s30_s20, 2048  ;;  %p833_p6 = scmp.lt.s32.totalorder %s30_s20, %s30_s20 }
  0x10   :  { %p829_p5 = scmp.ne.s32.totalorder %s30_s20, %s828_s21  ;;  %p834_p7 = scmp.lt.s32.totalorder %s828_s21, %s828_s21 }
  0x12   :  { %p835_p8 = por %p834_p7, %p833_p6 }
  0x14   :  { %p836_p9 = pnand %p835_p8, %p829_p5 }
  0x16   :  { %839 = shalt.err (!%p836_p9)
}
  0x17   :  { %35 = dma.hbm_to_vmem [thread:$0]  %s961_s2, 2048, %s30_s20, [#allocation5], %s845_s15, %s845_s15, %s846_s16  }
  0x18   :  { %840 = dma.done.wait [#allocation3], 2048  }
  0x19   :  { %841 = vsyncadd [#allocation3], 4294965248 }
  0x1a   :  { %842 = dma.done.wait [#allocation5], 2048  }
  0x1b   :  { %843 = vsyncadd [#allocation5], 4294965248  ;;  %v848_v0 = vmov 0   ;;  %v760_v1 = vld [vmem:[%s960_s1 + $0x78] sm:$0xff]   ;;  %v762_v3 = vld [vmem:[%s960_s1 + $0x70] sm:$0xff]  }
  0x1c   :  { %759 = vset.pattern.permute.xlu1 %v848_v0  ;;  %758 = vset.pattern.permute.xlu0 %v848_v0  ;;  %v761_v2 = vld [vmem:[%s960_s1 + $0x38] sm:$0xff]   ;;  %v763_v4 = vld [vmem:[%s960_s1 + $0x30] sm:$0xff]   ;;  %v764_v5 = vld [vmem:[%s960_s1 + $0x68] sm:$0xff]  }
  0x1d   :  { %673 = vmatprep.subr.bf16.mxu0 %v760_v1  ;;  %737 = vmatprep.subr.bf16.mxu1 %v760_v1  ;;  %v765_v6 = vld [vmem:[%s960_s1 + $0x28] sm:$0xff]   ;;  %v766_v7 = vld [vmem:[%s960_s1 + $0x60] sm:$0xff]   ;;  %v768_v9 = vld [vmem:[%s960_s1 + $0x58] sm:$0xff]  }
  0x1e   :  { %674 = vmatpush3.bf16.msra.mxu0 %v761_v2  ;;  %745 = vmatpush3.bf16.msra.mxu1 %v761_v2  ;;  %v767_v8 = vld [vmem:[%s960_s1 + $0x20] sm:$0xff]   ;;  %v769_v10 = vld [vmem:[%s960_s1 + $0x18] sm:$0xff]   ;;  %v770_v11 = vld [vmem:[%s960_s1 + $0x50] sm:$0xff]  }
  0x1f   :  { %675 = vmatprep.subr.bf16.mxu0 %v762_v3  ;;  %738 = vmatprep.subr.bf16.mxu1 %v762_v3  ;;  %v778_v12 = vld [vmem:[#allocation2 + $0x4] ss:$8 sps:$4 sm:$0xff]   ;;  %v771_v14 = vld [vmem:[%s960_s1 + $0x10] sm:$0xff]   ;;  %v776_v21 = vld [vmem:[#allocation2] ss:$8 sps:$4 sm:$0xff]  }
  0x20   :  { %v781_v13 = vld [vmem:[#allocation2 + $0x44] ss:$8 sps:$4 sm:$0xff]   ;;  %395 = vmatprep.mubr.bf16.mxu0 %v778_v12  ;;  %v93_v18 = vld [vmem:[#allocation4 + $0x10] sm:$0xff]  ;;  %v779_v22 = vld [vmem:[#allocation2 + $0x40] ss:$8 sps:$4 sm:$0xff]  }
  0x21   :  { %v772_v15 = vld [vmem:[%s960_s1 + $0x48] sm:$0xff]   ;;  %427 = vmatprep.mubr.bf16.mxu1 %v781_v13  ;;  %v774_v17 = vld [vmem:[%s960_s1 + $0x40] sm:$0xff]   ;;  %119 = vperm.xlu1 %759, %v93_v18   ;;  %v94_v23 = vld [vmem:[#allocation4 + $0x18] sm:$0xff] }
  0x22   :  { %676 = vmatpush3.bf16.msra.mxu0 %v763_v4  ;;  %746 = vmatpush3.bf16.msra.mxu1 %v763_v4  ;;  %v773_v16 = vld [vmem:[%s960_s1 + $0x8] sm:$0xff]   ;;  %v775_v19 = vld [vmem:[%s960_s1] sm:$0xff]   ;;  %v782_v25 = vld [vmem:[#allocation2 + $0x14] ss:$8 sps:$4 sm:$0xff]  }
  0x23   :  { %677 = vmatprep.subr.bf16.mxu0 %v764_v5  ;;  %739 = vmatprep.subr.bf16.mxu1 %v764_v5  ;;  %v91_v20 = vld [vmem:[#allocation4] sm:$0xff]  ;;  %v92_v24 = vld [vmem:[#allocation4 + $0x8] sm:$0xff]  ;;  %v784_v26 = vld [vmem:[#allocation2 + $0x54] ss:$8 sps:$4 sm:$0xff]  }
  0x24   :  { %109 = vperm.xlu0 %758, %v91_v20   ;;  %v96_v27 = vld [vmem:[#allocation4 + $0x28] sm:$0xff]  ;;  %v95_v28 = vld [vmem:[#allocation4 + $0x20] sm:$0xff]  ;;  %v786_v29 = vld [vmem:[#allocation2 + $0x10] ss:$8 sps:$4 sm:$0xff]  }
  0x25   :  { %124 = vperm.xlu1 %759, %v94_v23   ;;  %v787_v30 = vld [vmem:[#allocation2 + $0x50] ss:$8 sps:$4 sm:$0xff]   ;;  %v788_v33 = vld [vmem:[#allocation2 + $0x24] ss:$8 sps:$4 sm:$0xff]   ;;  %v792_v37 = vld [vmem:[#allocation2 + $0x20] ss:$8 sps:$4 sm:$0xff]  }
  0x26   :  { %678 = vmatpush3.bf16.msra.mxu0 %v765_v6  ;;  %747 = vmatpush3.bf16.msra.mxu1 %v765_v6  ;;  %v98_v31 = vld [vmem:[#allocation4 + $0x38] sm:$0xff]  ;;  %v97_v32 = vld [vmem:[#allocation4 + $0x30] sm:$0xff]  ;;  %v790_v34 = vld [vmem:[#allocation2 + $0x64] ss:$8 sps:$4 sm:$0xff]  }
  0x27   :  { %679 = vmatprep.subr.bf16.mxu0 %v766_v7  ;;  %740 = vmatprep.subr.bf16.mxu1 %v766_v7  ;;  %v100_v35 = vld [vmem:[#allocation4 + $0x48] sm:$0xff]  ;;  %v99_v36 = vld [vmem:[#allocation4 + $0x40] sm:$0xff]  ;;  %v102_v39 = vld [vmem:[#allocation4 + $0x58] sm:$0xff] }
  0x28   :  { %114 = vperm.xlu0 %758, %v92_v24   ;;  %v793_v38 = vld [vmem:[#allocation2 + $0x60] ss:$8 sps:$4 sm:$0xff]   ;;  %v101_v40 = vld [vmem:[#allocation4 + $0x50] sm:$0xff]  ;;  %v106_v47 = vld [vmem:[#allocation4 + $0x78] sm:$0xff] }
  0x29   :  { %134 = vperm.xlu1 %759, %v96_v27   ;;  %v794_v41 = vld [vmem:[#allocation2 + $0x34] ss:$8 sps:$4 sm:$0xff]   ;;  %v104_v43 = vld [vmem:[#allocation4 + $0x68] sm:$0xff]  ;;  %v103_v44 = vld [vmem:[#allocation4 + $0x60] sm:$0xff] }
  0x2a   :  { %680 = vmatpush3.bf16.msra.mxu0 %v767_v8  ;;  %748 = vmatpush3.bf16.msra.mxu1 %v767_v8  ;;  %v796_v42 = vld [vmem:[#allocation2 + $0x74] ss:$8 sps:$4 sm:$0xff]   ;;  %v798_v45 = vld [vmem:[#allocation2 + $0x30] ss:$8 sps:$4 sm:$0xff]  }
  0x2b   :  { %681 = vmatprep.subr.bf16.mxu0 %v768_v9  ;;  %741 = vmatprep.subr.bf16.mxu1 %v768_v9  ;;  %v799_v46 = vld [vmem:[#allocation2 + $0x70] ss:$8 sps:$4 sm:$0xff]  }
  0x2c   :  { %129 = vperm.xlu0 %758, %v95_v28   ;;  %v105_v48 = vld [vmem:[#allocation4 + $0x70] sm:$0xff] }
  0x2d   :  { %144 = vperm.xlu1 %759, %v98_v31  }
  0x2e   :  { %682 = vmatpush3.bf16.msra.mxu0 %v769_v10  ;;  %749 = vmatpush3.bf16.msra.mxu1 %v769_v10 }
  0x2f   :  { %683 = vmatprep.subr.bf16.mxu0 %v770_v11  ;;  %742 = vmatprep.subr.bf16.mxu1 %v770_v11 }
  0x30   :  { %139 = vperm.xlu0 %758, %v97_v32  }
  0x31   :  { %154 = vperm.xlu1 %759, %v100_v35  }
  0x32   :  { %684 = vmatpush3.bf16.msra.mxu0 %v771_v14  ;;  %750 = vmatpush3.bf16.msra.mxu1 %v771_v14 }
  0x33   :  { %685 = vmatprep.subr.bf16.mxu0 %v772_v15  ;;  %743 = vmatprep.subr.bf16.mxu1 %v772_v15 }
  0x34   :  { %149 = vperm.xlu0 %758, %v99_v36  }
  0x35   :  { %164 = vperm.xlu1 %759, %v102_v39  }
  0x36   :  { %686 = vmatpush3.bf16.msra.mxu0 %v773_v16  ;;  %751 = vmatpush3.bf16.msra.mxu1 %v773_v16 }
  0x37   :  { %687 = vmatprep.subr.bf16.mxu0 %v774_v17  ;;  %744 = vmatprep.subr.bf16.mxu1 %v774_v17 }
  0x38   :  { %159 = vperm.xlu0 %758, %v101_v40  }
  0x39   :  { %174 = vperm.xlu1 %759, %v104_v43  }
  0x3a   :  { %688 = vmatpush3.bf16.msra.mxu0 %v775_v19  ;;  %752 = vmatpush3.bf16.msra.mxu1 %v775_v19 }
  0x3c   :  { %169 = vperm.xlu0 %758, %v103_v44  }
  0x3d   :  { %396 = vmatmul.mubr.bf16.vlgmr.msra.gmra.mxu0 %v776_v21  ;;  %428 = vmatmul.mubr.bf16.vlgmr.msra.gmra.mxu1 %v779_v22 }
  0x3e   :  { %403 = vmatprep.mubr.bf16.mxu0 %v782_v25  ;;  %435 = vmatprep.mubr.bf16.mxu1 %v784_v26 }
  0x3f   :  { %184 = vperm.xlu1 %759, %v106_v47  }
  0x40   :  { %179 = vperm.xlu0 %758, %v105_v48  }
  0x45   :  { %404 = vmatmul.mubr.bf16.gmra.mxu0 %v786_v29  ;;  %436 = vmatmul.mubr.bf16.gmra.mxu1 %v787_v30 }
  0x46   :  { %411 = vmatprep.mubr.bf16.mxu0 %v788_v33  ;;  %443 = vmatprep.mubr.bf16.mxu1 %v790_v34 }
  0x4d   :  { %412 = vmatmul.mubr.bf16.gmra.mxu0 %v792_v37  ;;  %444 = vmatmul.mubr.bf16.gmra.mxu1 %v793_v38 }
  0x4e   :  { %419 = vmatprep.mubr.bf16.mxu0 %v794_v41  ;;  %451 = vmatprep.mubr.bf16.mxu1 %v796_v42 }
  0x55   :  { %420 = vmatmul.mubr.bf16.gmra.mxu0 %v798_v45  ;;  %452 = vmatmul.mubr.bf16.gmra.mxu1 %v799_v46 }
  0x9c   :  { %v120_v50 = vpop.permute.xlu1 %119 }
  0x9f   :  { %v110_v49 = vpop.permute.xlu0 %109 }
  0xa0   :  { %v125_v52 = vpop.permute.xlu1 %124 }
  0xa3   :  { %v115_v51 = vpop.permute.xlu0 %114 }
  0xa4   :  { %v925_v54 = vpop.permute.xlu1 %134 }
  0xa7   :  { %v923_v53 = vpop.permute.xlu0 %129 }
  0xa8   :  { %v929_v58 = vpop.permute.xlu1 %144 }
  0xab   :  { %v927_v55 = vpop.permute.xlu0 %139 }
  0xac   :  { %v155_v6 = vpop.permute.xlu1 %154 }
  0xaf   :  { %v150_v1 = vpop.permute.xlu0 %149 }
  0xb0   :  { %v165_v30 = vpop.permute.xlu1 %164 }
  0xb3   :  { %v160_v23 = vpop.permute.xlu0 %159 }
  0xb7   :  { %v170_v47 = vpop.permute.xlu0 %169 }
  0xfd   :  { %v689_v56 = vpop.f32.mrf.mxu0  ;;  %v713_v57 = vpop.f32.mrf.mxu1 }
  0xff   :  { %v690_v59 = vpop.f32.mrf.mxu0  ;;  %v714_v60 = vpop.f32.mrf.mxu1 }
 0x100   :  { %v691_v61 = vadd.f32 %v690_v59, %v689_v56  ;;  %v715_v62 = vadd.f32 %v714_v60, %v713_v57 }
 0x101   :  { %v692_v63 = vpop.f32.mrf.mxu0  ;;  %v716_v0 = vpop.f32.mrf.mxu1 }
 0x102   :  { %v398_v2 = vadd.f32 %v691_v61, %v110_v49  ;;  %v430_v3 = vadd.f32 %v715_v62, %v150_v1 }
 0x103   :  { %v693_v4 = vpop.f32.mrf.mxu0  ;;  %v717_v5 = vpop.f32.mrf.mxu1 }
 0x104   :  { %v694_v7 = vadd.f32 %v693_v4, %v692_v63  ;;  %v718_v8 = vadd.f32 %v717_v5, %v716_v0  ;;  %v460_v13 = vmax.f32 %v398_v2, 0.0  ;;  %v468_v14 = vmax.f32 %v430_v3, 0.0 }
 0x105   :  { %v695_v9 = vpop.f32.mrf.mxu0  ;;  %v719_v10 = vpop.f32.mrf.mxu1 }
 0x106   :  { %v401_v11 = vadd.f32 %v694_v7, %v115_v51  ;;  %v433_v12 = vadd.f32 %v718_v8, %v155_v6 }
 0x107   :  { %v696_v15 = vpop.f32.mrf.mxu0  ;;  %v720_v16 = vpop.f32.mrf.mxu1 }
 0x108   :  { %v461_v17 = vmax.f32 %v401_v11, 0.0  ;;  %v469_v18 = vmax.f32 %v433_v12, 0.0  ;;  %v697_v19 = vadd.f32 %v696_v15, %v695_v9  ;;  %v721_v20 = vadd.f32 %v720_v16, %v719_v10  ;;  %v180_v10 = vpop.permute.xlu0 %179 }
 0x109   :  { %v698_v21 = vpop.f32.mrf.mxu0  ;;  %v722_v22 = vpop.f32.mrf.mxu1 }
 0x10a   :  { %v629_v24 = vpack.c.bf16 %v461_v17, %v460_v13  ;;  %v649_v25 = vpack.c.bf16 %v469_v18, %v468_v14  ;;  %v406_v26 = vadd.f32 %v697_v19, %v120_v50  ;;  %v438_v27 = vadd.f32 %v721_v20, %v160_v23 }
 0x10b   :  { %v699_v28 = vpop.f32.mrf.mxu0  ;;  %v723_v29 = vpop.f32.mrf.mxu1 }
 0x10c   :  { %630 = vst [vmem:[%s962_s3] sm:$0xff] %v629_v24   ;;  %669 = vst [vmem:[%s962_s3 + $0x20] sm:$0xff] %v649_v25   ;;  %v700_v31 = vadd.f32 %v699_v28, %v698_v21  ;;  %v724_v32 = vadd.f32 %v723_v29, %v722_v22  ;;  %v462_v37 = vmax.f32 %v406_v26, 0.0  ;;  %v470_v38 = vmax.f32 %v438_v27, 0.0 }
 0x10d   :  { %v701_v33 = vpop.f32.mrf.mxu0  ;;  %v725_v34 = vpop.f32.mrf.mxu1 }
 0x10e   :  { %v409_v35 = vadd.f32 %v700_v31, %v125_v52  ;;  %v441_v36 = vadd.f32 %v724_v32, %v165_v30  ;;  %v175_v52 = vpop.permute.xlu1 %174 }
 0x10f   :  { %v702_v39 = vpop.f32.mrf.mxu0  ;;  %v726_v40 = vpop.f32.mrf.mxu1 }
 0x110   :  { %v463_v41 = vmax.f32 %v409_v35, 0.0  ;;  %v471_v42 = vmax.f32 %v441_v36, 0.0  ;;  %v703_v43 = vadd.f32 %v702_v39, %v701_v33  ;;  %v727_v44 = vadd.f32 %v726_v40, %v725_v34 }
 0x111   :  { %v704_v45 = vpop.f32.mrf.mxu0  ;;  %v728_v46 = vpop.f32.mrf.mxu1 }
 0x112   :  { %v634_v48 = vpack.c.bf16 %v463_v41, %v462_v37  ;;  %v654_v49 = vpack.c.bf16 %v471_v42, %v470_v38  ;;  %v414_v50 = vadd.f32 %v703_v43, %v923_v53  ;;  %v446_v51 = vadd.f32 %v727_v44, %v170_v47  ;;  %v185_v18 = vpop.permute.xlu1 %184 }
 0x113   :  { %v705_v56 = vpop.f32.mrf.mxu0  ;;  %v729_v57 = vpop.f32.mrf.mxu1 }
 0x114   :  { %666 = vst [vmem:[%s962_s3 + $0x8] sm:$0xff] %v634_v48   ;;  %670 = vst [vmem:[%s962_s3 + $0x28] sm:$0xff] %v654_v49   ;;  %v706_v59 = vadd.f32 %v705_v56, %v704_v45  ;;  %v730_v60 = vadd.f32 %v729_v57, %v728_v46  ;;  %v464_v53 = vmax.f32 %v414_v50, 0.0  ;;  %v472_v1 = vmax.f32 %v446_v51, 0.0 }
 0x115   :  { %v707_v61 = vpop.f32.mrf.mxu0  ;;  %v731_v62 = vpop.f32.mrf.mxu1 }
 0x116   :  { %v417_v63 = vadd.f32 %v706_v59, %v925_v54  ;;  %v449_v0 = vadd.f32 %v730_v60, %v175_v52 }
 0x117   :  { %v708_v2 = vpop.f32.mrf.mxu0  ;;  %v732_v3 = vpop.f32.mrf.mxu1 }
 0x118   :  { %v465_v4 = vmax.f32 %v417_v63, 0.0  ;;  %v473_v5 = vmax.f32 %v449_v0, 0.0  ;;  %v709_v6 = vadd.f32 %v708_v2, %v707_v61  ;;  %v733_v7 = vadd.f32 %v732_v3, %v731_v62 }
 0x119   :  { %v710_v8 = vpop.f32.mrf.mxu0  ;;  %v734_v9 = vpop.f32.mrf.mxu1 }
 0x11a   :  { %v639_v11 = vpack.c.bf16 %v465_v4, %v464_v53  ;;  %v659_v12 = vpack.c.bf16 %v473_v5, %v472_v1  ;;  %v422_v54 = vadd.f32 %v709_v6, %v927_v55  ;;  %v454_v15 = vadd.f32 %v733_v7, %v180_v10 }
 0x11b   :  { %v711_v13 = vpop.f32.mrf.mxu0  ;;  %v735_v14 = vpop.f32.mrf.mxu1 }
 0x11c   :  { %667 = vst [vmem:[%s962_s3 + $0x10] sm:$0xff] %v639_v11   ;;  %671 = vst [vmem:[%s962_s3 + $0x30] sm:$0xff] %v659_v12   ;;  %v712_v16 = vadd.f32 %v711_v13, %v710_v8  ;;  %v736_v17 = vadd.f32 %v735_v14, %v734_v9  ;;  %v466_v21 = vmax.f32 %v422_v54, 0.0  ;;  %v474_v22 = vmax.f32 %v454_v15, 0.0 }
 0x11e   :  { %v425_v19 = vadd.f32 %v712_v16, %v929_v58  ;;  %v457_v20 = vadd.f32 %v736_v17, %v185_v18 }
 0x120   :  { %v467_v23 = vmax.f32 %v425_v19, 0.0  ;;  %v475_v24 = vmax.f32 %v457_v20, 0.0 }
 0x122   :  { %v644_v25 = vpack.c.bf16 %v467_v23, %v466_v21  ;;  %v664_v26 = vpack.c.bf16 %v475_v24, %v474_v22 }
 0x124   :  { %668 = vst [vmem:[%s962_s3 + $0x18] sm:$0xff] %v644_v25   ;;  %672 = vst [vmem:[%s962_s3 + $0x38] sm:$0xff] %v664_v26  }
 0x125   :  { %560 = vsyncpa [#allocation3], 1 }
 0x126   :  { %561 = vsyncpa [#allocation5], 1 }

// kernel: forward.4
= control target key start
LH: loop header
LB: loop body
LE: loop exit
PB: predicated region body
PF: predicated region fallthrough
CT: control target
= control target key end

     0   :  { %8 = vsyncpa [#allocation3], 0  ;;  %s1516_s0 = inlined_call_operand.hbm [shape: bf16[256,256], index: 0, kind: input, shape index: {}]   ;;  %s1517_s1 = inlined_call_operand.vmem [shape: bf16[256,32], index: 1, kind: input, shape index: {}]   ;;  %s1518_s2 = inlined_call_operand.hbm [shape: f32[256,1], index: 2, kind: input, shape index: {}]   ;;  %s1519_s3 = inlined_call_operand.vmem [shape: bf16[256,32], index: 3, kind: output, shape index: {}]  }
   0x1   :  { %9 = vsyncpa [#allocation5], 0  ;;  %s1270_s12 = smov [#allocation2]  }
   0x2   :  { %s15_s13 = sshll.u32 %s1270_s12, 4  ;;  %s16_s13 = int_to_ptr.vmem [resolvable:$true] %s15_s13 }
   0x3   :  { %s1234_s14 = scalar_lea.vmem %s16_s13, 4096  ;;  %p1239_p1 = scmp.lt.s32.totalorder %s16_s13, %s16_s13 }
   0x4   :  { %p1235_p0 = scmp.ne.s32.totalorder %s16_s13, %s1234_s14  ;;  %p1240_p2 = scmp.lt.s32.totalorder %s1234_s14, %s1234_s14 }
   0x6   :  { %p1241_p3 = por %p1240_p2, %p1239_p1 }
   0x8   :  { %p1242_p4 = pnand %p1241_p3, %p1235_p0 }
   0xa   :  { %1245 = shalt.err (!%p1242_p4)
}
   0xb   :  { %s1271_s15 = smov 128   ;;  %s1272_s16 = smov 8  }
   0xc   :  { %21 = dma.hbm_to_vmem [thread:$0]  %s1516_s0, 4096, %s16_s13, [#allocation3], %s1271_s15, %s1271_s15, %s1272_s16  }
   0xd   :  { %s1273_s19 = smov [#allocation4]  }
   0xe   :  { %s29_s20 = sshll.u32 %s1273_s19, 4  ;;  %s30_s20 = int_to_ptr.vmem [resolvable:$true] %s29_s20 }
   0xf   :  { %s1254_s21 = scalar_lea.vmem %s30_s20, 4096  ;;  %p1259_p6 = scmp.lt.s32.totalorder %s30_s20, %s30_s20 }
  0x10   :  { %p1255_p5 = scmp.ne.s32.totalorder %s30_s20, %s1254_s21  ;;  %p1260_p7 = scmp.lt.s32.totalorder %s1254_s21, %s1254_s21 }
  0x12   :  { %p1261_p8 = por %p1260_p7, %p1259_p6 }
  0x14   :  { %p1262_p9 = pnand %p1261_p8, %p1255_p5 }
  0x16   :  { %1265 = shalt.err (!%p1262_p9)
}
  0x17   :  { %35 = dma.hbm_to_vmem [thread:$0]  %s1518_s2, 4096, %s30_s20, [#allocation5], %s1271_s15, %s1271_s15, %s1272_s16  }
  0x18   :  { %1266 = dma.done.wait [#allocation3], 4096  }
  0x19   :  { %1267 = vsyncadd [#allocation3], 4294963200 }
  0x1a   :  { %1268 = dma.done.wait [#allocation5], 4096  }
  0x1b   :  { %1269 = vsyncadd [#allocation5], 4294963200  ;;  %v1274_v0 = vmov 0   ;;  %v1162_v1 = vld [vmem:[%s1517_s1 + $0x78] sm:$0xff]   ;;  %v1164_v3 = vld [vmem:[%s1517_s1 + $0x70] sm:$0xff]   ;;  %vm876_vm0 = vcmask 257024  }
  0x1c   :  { %1161 = vset.pattern.permute.xlu1 %v1274_v0  ;;  %1160 = vset.pattern.permute.xlu0 %v1274_v0  ;;  %v1163_v2 = vld [vmem:[%s1517_s1 + $0x38] sm:$0xff]   ;;  %v1165_v4 = vld [vmem:[%s1517_s1 + $0x30] sm:$0xff]   ;;  %v1166_v5 = vld [vmem:[%s1517_s1 + $0x68] sm:$0xff]  }
  0x1d   :  { %1027 = vmatprep.subr.bf16.mxu0 %v1162_v1  ;;  %1139 = vmatprep.subr.bf16.mxu1 %v1162_v1  ;;  %v1167_v6 = vld [vmem:[%s1517_s1 + $0x28] sm:$0xff]   ;;  %v1168_v7 = vld [vmem:[%s1517_s1 + $0x60] sm:$0xff]   ;;  %v1170_v9 = vld [vmem:[%s1517_s1 + $0x58] sm:$0xff]  }
  0x1e   :  { %1028 = vmatpush3.bf16.msra.mxu0 %v1163_v2  ;;  %1147 = vmatpush3.bf16.msra.mxu1 %v1163_v2  ;;  %v1169_v8 = vld [vmem:[%s1517_s1 + $0x20] sm:$0xff]   ;;  %v1171_v10 = vld [vmem:[%s1517_s1 + $0x18] sm:$0xff]   ;;  %v1172_v11 = vld [vmem:[%s1517_s1 + $0x50] sm:$0xff]  }
  0x1f   :  { %1029 = vmatprep.subr.bf16.mxu0 %v1164_v3  ;;  %1140 = vmatprep.subr.bf16.mxu1 %v1164_v3  ;;  %v1180_v12 = vld [vmem:[#allocation2 + $0x4] ss:$8 sps:$4 sm:$0xff]   ;;  %v1173_v14 = vld [vmem:[%s1517_s1 + $0x10] sm:$0xff]   ;;  %v110_v20 = vld [vmem:[#allocation4 + $0x18] sm:$0xff] }
  0x20   :  { %v1183_v13 = vld [vmem:[#allocation2 + $0x84] ss:$8 sps:$4 sm:$0xff]   ;;  %587 = vmatprep.mubr.bf16.mxu0 %v1180_v12  ;;  %v109_v16 = vld [vmem:[#allocation4 + $0x10] sm:$0xff]  ;;  %v1178_v25 = vld [vmem:[#allocation2] ss:$8 sps:$4 sm:$0xff]  }
  0x21   :  { %v1174_v15 = vld [vmem:[%s1517_s1 + $0x48] sm:$0xff]   ;;  %651 = vmatprep.mubr.bf16.mxu1 %v1183_v13  ;;  %v107_v17 = vld [vmem:[#allocation4] sm:$0xff]  ;;  %151 = vperm.xlu1 %1161, %v109_v16   ;;  %v1184_v27 = vld [vmem:[#allocation2 + $0x14] ss:$8 sps:$4 sm:$0xff]  }
  0x22   :  { %1030 = vmatpush3.bf16.msra.mxu0 %v1165_v4  ;;  %1148 = vmatpush3.bf16.msra.mxu1 %v1165_v4  ;;  %v1175_v18 = vld [vmem:[%s1517_s1 + $0x8] sm:$0xff]   ;;  %v1176_v19 = vld [vmem:[%s1517_s1 + $0x40] sm:$0xff]   ;;  %v1186_v28 = vld [vmem:[#allocation2 + $0x94] ss:$8 sps:$4 sm:$0xff]  }
  0x23   :  { %1031 = vmatprep.subr.bf16.mxu0 %v1166_v5  ;;  %1141 = vmatprep.subr.bf16.mxu1 %v1166_v5  ;;  %v1177_v21 = vld [vmem:[%s1517_s1] sm:$0xff]   ;;  %v108_v22 = vld [vmem:[#allocation4 + $0x8] sm:$0xff]  ;;  %v114_v29 = vld [vmem:[#allocation4 + $0x38] sm:$0xff] }
  0x24   :  { %141 = vperm.xlu0 %1160, %v107_v17   ;;  %v112_v23 = vld [vmem:[#allocation4 + $0x28] sm:$0xff]  ;;  %v111_v24 = vld [vmem:[#allocation4 + $0x20] sm:$0xff]  ;;  %v113_v30 = vld [vmem:[#allocation4 + $0x30] sm:$0xff] }
  0x25   :  { %156 = vperm.xlu1 %1161, %v110_v20   ;;  %v1181_v26 = vld [vmem:[#allocation2 + $0x80] ss:$8 sps:$4 sm:$0xff]   ;;  %v1188_v31 = vld [vmem:[#allocation2 + $0x10] ss:$8 sps:$4 sm:$0xff]   ;;  %v1190_v35 = vld [vmem:[#allocation2 + $0x24] ss:$8 sps:$4 sm:$0xff]  }
  0x26   :  { %1032 = vmatpush3.bf16.msra.mxu0 %v1167_v6  ;;  %1149 = vmatpush3.bf16.msra.mxu1 %v1167_v6  ;;  %v1189_v32 = vld [vmem:[#allocation2 + $0x90] ss:$8 sps:$4 sm:$0xff]   ;;  %v116_v33 = vld [vmem:[#allocation4 + $0x48] sm:$0xff]  ;;  %v115_v34 = vld [vmem:[#allocation4 + $0x40] sm:$0xff] }
  0x27   :  { %1033 = vmatprep.subr.bf16.mxu0 %v1168_v7  ;;  %1142 = vmatprep.subr.bf16.mxu1 %v1168_v7  ;;  %v1192_v36 = vld [vmem:[#allocation2 + $0xa4] ss:$8 sps:$4 sm:$0xff]   ;;  %v118_v37 = vld [vmem:[#allocation4 + $0x58] sm:$0xff]  ;;  %v117_v38 = vld [vmem:[#allocation4 + $0x50] sm:$0xff] }
  0x28   :  { %146 = vperm.xlu0 %1160, %v108_v22   ;;  %v120_v39 = vld [vmem:[#allocation4 + $0x68] sm:$0xff]  ;;  %v119_v40 = vld [vmem:[#allocation4 + $0x60] sm:$0xff]  ;;  %v1196_v43 = vld [vmem:[#allocation2 + $0x34] ss:$8 sps:$4 sm:$0xff]  }
  0x29   :  { %166 = vperm.xlu1 %1161, %v112_v23   ;;  %v1194_v41 = vld [vmem:[#allocation2 + $0x20] ss:$8 sps:$4 sm:$0xff]   ;;  %v1198_v44 = vld [vmem:[#allocation2 + $0xb4] ss:$8 sps:$4 sm:$0xff]   ;;  %v1200_v49 = vld [vmem:[#allocation2 + $0x30] ss:$8 sps:$4 sm:$0xff]  }
  0x2a   :  { %1034 = vmatpush3.bf16.msra.mxu0 %v1169_v8  ;;  %1150 = vmatpush3.bf16.msra.mxu1 %v1169_v8  ;;  %v1195_v42 = vld [vmem:[#allocation2 + $0xa0] ss:$8 sps:$4 sm:$0xff]   ;;  %v122_v45 = vld [vmem:[#allocation4 + $0x78] sm:$0xff]  ;;  %v121_v46 = vld [vmem:[#allocation4 + $0x70] sm:$0xff] }
  0x2b   :  { %1035 = vmatprep.subr.bf16.mxu0 %v1170_v9  ;;  %1143 = vmatprep.subr.bf16.mxu1 %v1170_v9  ;;  %v124_v47 = vld [vmem:[#allocation4 + $0x88] sm:$0xff]  ;;  %v123_v48 = vld [vmem:[#allocation4 + $0x80] sm:$0xff]  ;;  %v1201_v50 = vld [vmem:[#allocation2 + $0xb0] ss:$8 sps:$4 sm:$0xff]  }
  0x2c   :  { %161 = vperm.xlu0 %1160, %v111_v24   ;;  %v1202_v51 = vld [vmem:[#allocation2 + $0x44] ss:$8 sps:$4 sm:$0xff]   ;;  %v126_v53 = vld [vmem:[#allocation4 + $0x98] sm:$0xff]  ;;  %v125_v54 = vld [vmem:[#allocation4 + $0x90] sm:$0xff] }
  0x2d   :  { %176 = vperm.xlu1 %1161, %v114_v29   ;;  %v1204_v52 = vld [vmem:[#allocation2 + $0xc4] ss:$8 sps:$4 sm:$0xff]   ;;  %v1206_v57 = vld [vmem:[#allocation2 + $0x40] ss:$8 sps:$4 sm:$0xff]   ;;  %v1208_v59 = vld [vmem:[#allocation2 + $0x54] ss:$8 sps:$4 sm:$0xff]  }
  0x2e   :  { %1036 = vmatpush3.bf16.msra.mxu0 %v1171_v10  ;;  %1151 = vmatpush3.bf16.msra.mxu1 %v1171_v10  ;;  %v128_v55 = vld [vmem:[#allocation4 + $0xa8] sm:$0xff]  ;;  %v127_v56 = vld [vmem:[#allocation4 + $0xa0] sm:$0xff]  ;;  %v1210_v60 = vld [vmem:[#allocation2 + $0xd4] ss:$8 sps:$4 sm:$0xff]  }
  0x2f   :  { %1037 = vmatprep.subr.bf16.mxu0 %v1172_v11  ;;  %1144 = vmatprep.subr.bf16.mxu1 %v1172_v11  ;;  %v1207_v58 = vld [vmem:[#allocation2 + $0xc0] ss:$8 sps:$4 sm:$0xff]   ;;  %v130_v61 = vld [vmem:[#allocation4 + $0xb8] sm:$0xff]  ;;  %v129_v62 = vld [vmem:[#allocation4 + $0xb0] sm:$0xff] }
  0x30   :  { %171 = vperm.xlu0 %1160, %v113_v30   ;;  %v132_v63 = vld [vmem:[#allocation4 + $0xc8] sm:$0xff]  ;;  %v131_v0 = vld [vmem:[#allocation4 + $0xc0] sm:$0xff]  ;;  %v1212_v1 = vld [vmem:[#allocation2 + $0x50] ss:$8 sps:$4 sm:$0xff]  }
  0x31   :  { %186 = vperm.xlu1 %1161, %v116_v33   ;;  %v1213_v2 = vld [vmem:[#allocation2 + $0xd0] ss:$8 sps:$4 sm:$0xff]   ;;  %v1214_v3 = vld [vmem:[#allocation2 + $0x64] ss:$8 sps:$4 sm:$0xff]   ;;  %v1218_v9 = vld [vmem:[#allocation2 + $0x60] ss:$8 sps:$4 sm:$0xff]  }
  0x32   :  { %1038 = vmatpush3.bf16.msra.mxu0 %v1173_v14  ;;  %1152 = vmatpush3.bf16.msra.mxu1 %v1173_v14  ;;  %v1216_v4 = vld [vmem:[#allocation2 + $0xe4] ss:$8 sps:$4 sm:$0xff]   ;;  %v134_v5 = vld [vmem:[#allocation4 + $0xd8] sm:$0xff]  ;;  %v133_v6 = vld [vmem:[#allocation4 + $0xd0] sm:$0xff] }
  0x33   :  { %1039 = vmatprep.subr.bf16.mxu0 %v1174_v15  ;;  %1145 = vmatprep.subr.bf16.mxu1 %v1174_v15  ;;  %v136_v7 = vld [vmem:[#allocation4 + $0xe8] sm:$0xff]  ;;  %v135_v8 = vld [vmem:[#allocation4 + $0xe0] sm:$0xff]  ;;  %v1220_v11 = vld [vmem:[#allocation2 + $0x74] ss:$8 sps:$4 sm:$0xff]  }
  0x34   :  { %181 = vperm.xlu0 %1160, %v115_v34   ;;  %v1219_v10 = vld [vmem:[#allocation2 + $0xe0] ss:$8 sps:$4 sm:$0xff]   ;;  %v1222_v12 = vld [vmem:[#allocation2 + $0xf4] ss:$8 sps:$4 sm:$0xff]   ;;  %v1224_v15 = vld [vmem:[#allocation2 + $0x70] ss:$8 sps:$4 sm:$0xff]  }
  0x35   :  { %196 = vperm.xlu1 %1161, %v118_v37   ;;  %v138_v13 = vld [vmem:[#allocation4 + $0xf8] sm:$0xff]  ;;  %v137_v14 = vld [vmem:[#allocation4 + $0xf0] sm:$0xff] }
  0x36   :  { %1040 = vmatpush3.bf16.msra.mxu0 %v1175_v18  ;;  %1153 = vmatpush3.bf16.msra.mxu1 %v1175_v18  ;;  %v1225_v16 = vld [vmem:[#allocation2 + $0xf0] ss:$8 sps:$4 sm:$0xff]  }
  0x37   :  { %1041 = vmatprep.subr.bf16.mxu0 %v1176_v19  ;;  %1146 = vmatprep.subr.bf16.mxu1 %v1176_v19 }
  0x38   :  { %191 = vperm.xlu0 %1160, %v117_v38  }
  0x39   :  { %206 = vperm.xlu1 %1161, %v120_v39  }
  0x3a   :  { %1042 = vmatpush3.bf16.msra.mxu0 %v1177_v21  ;;  %1154 = vmatpush3.bf16.msra.mxu1 %v1177_v21 }
  0x3c   :  { %201 = vperm.xlu0 %1160, %v119_v40  }
  0x3d   :  { %588 = vmatmul.mubr.bf16.vlgmr.msra.gmra.mxu0 %v1178_v25  ;;  %652 = vmatmul.mubr.bf16.vlgmr.msra.gmra.mxu1 %v1181_v26 }
  0x3e   :  { %595 = vmatprep.mubr.bf16.mxu0 %v1184_v27  ;;  %659 = vmatprep.mubr.bf16.mxu1 %v1186_v28 }
  0x3f   :  { %216 = vperm.xlu1 %1161, %v122_v45  }
  0x40   :  { %211 = vperm.xlu0 %1160, %v121_v46  }
  0x43   :  { %226 = vperm.xlu1 %1161, %v124_v47  }
  0x44   :  { %221 = vperm.xlu0 %1160, %v123_v48  }
  0x45   :  { %596 = vmatmul.mubr.bf16.gmra.mxu0 %v1188_v31  ;;  %660 = vmatmul.mubr.bf16.gmra.mxu1 %v1189_v32 }
  0x46   :  { %603 = vmatprep.mubr.bf16.mxu0 %v1190_v35  ;;  %667 = vmatprep.mubr.bf16.mxu1 %v1192_v36 }
  0x47   :  { %236 = vperm.xlu1 %1161, %v126_v53  }
  0x48   :  { %231 = vperm.xlu0 %1160, %v125_v54  }
  0x4b   :  { %246 = vperm.xlu1 %1161, %v128_v55  }
  0x4c   :  { %241 = vperm.xlu0 %1160, %v127_v56  }
  0x4d   :  { %604 = vmatmul.mubr.bf16.gmra.mxu0 %v1194_v41  ;;  %668 = vmatmul.mubr.bf16.gmra.mxu1 %v1195_v42 }
  0x4e   :  { %611 = vmatprep.mubr.bf16.mxu0 %v1196_v43  ;;  %675 = vmatprep.mubr.bf16.mxu1 %v1198_v44 }
  0x4f   :  { %256 = vperm.xlu1 %1161, %v130_v61  }
  0x50   :  { %251 = vperm.xlu0 %1160, %v129_v62  }
  0x53   :  { %266 = vperm.xlu1 %1161, %v132_v63  }
  0x54   :  { %261 = vperm.xlu0 %1160, %v131_v0  }
  0x55   :  { %612 = vmatmul.mubr.bf16.gmra.mxu0 %v1200_v49  ;;  %676 = vmatmul.mubr.bf16.gmra.mxu1 %v1201_v50 }
  0x56   :  { %619 = vmatprep.mubr.bf16.mxu0 %v1202_v51  ;;  %683 = vmatprep.mubr.bf16.mxu1 %v1204_v52 }
  0x57   :  { %276 = vperm.xlu1 %1161, %v134_v5  }
  0x58   :  { %271 = vperm.xlu0 %1160, %v133_v6  }
  0x5b   :  { %286 = vperm.xlu1 %1161, %v136_v7  }
  0x5c   :  { %281 = vperm.xlu0 %1160, %v135_v8  }
  0x5d   :  { %620 = vmatmul.mubr.bf16.gmra.mxu0 %v1206_v57  ;;  %684 = vmatmul.mubr.bf16.gmra.mxu1 %v1207_v58 }
  0x5e   :  { %627 = vmatprep.mubr.bf16.mxu0 %v1208_v59  ;;  %691 = vmatprep.mubr.bf16.mxu1 %v1210_v60 }
  0x5f   :  { %296 = vperm.xlu1 %1161, %v138_v13  }
  0x60   :  { %291 = vperm.xlu0 %1160, %v137_v14  }
  0x65   :  { %628 = vmatmul.mubr.bf16.gmra.mxu0 %v1212_v1  ;;  %692 = vmatmul.mubr.bf16.gmra.mxu1 %v1213_v2 }
  0x66   :  { %635 = vmatprep.mubr.bf16.mxu0 %v1214_v3  ;;  %699 = vmatprep.mubr.bf16.mxu1 %v1216_v4 }
  0x6d   :  { %636 = vmatmul.mubr.bf16.gmra.mxu0 %v1218_v9  ;;  %700 = vmatmul.mubr.bf16.gmra.mxu1 %v1219_v10 }
  0x6e   :  { %643 = vmatprep.mubr.bf16.mxu0 %v1220_v11  ;;  %707 = vmatprep.mubr.bf16.mxu1 %v1222_v12 }
  0x75   :  { %644 = vmatmul.mubr.bf16.gmra.mxu0 %v1224_v15  ;;  %708 = vmatmul.mubr.bf16.gmra.mxu1 %v1225_v16 }
  0x9c   :  { %v152_v18 = vpop.permute.xlu1 %151 }
  0x9f   :  { %v142_v17 = vpop.permute.xlu0 %141 }
  0xa0   :  { %v1349_v20 = vpop.permute.xlu1 %156 }
  0xa3   :  { %v147_v19 = vpop.permute.xlu0 %146 }
  0xa4   :  { %v1353_v22 = vpop.permute.xlu1 %166 }
  0xa7   :  { %v1351_v21 = vpop.permute.xlu0 %161 }
  0xa8   :  { %v1357_v24 = vpop.permute.xlu1 %176 }
  0xab   :  { %v1355_v23 = vpop.permute.xlu0 %171 }
  0xac   :  { %v1361_v26 = vpop.permute.xlu1 %186 }
  0xaf   :  { %v1359_v25 = vpop.permute.xlu0 %181 }
  0xb0   :  { %v1365_v28 = vpop.permute.xlu1 %196 }
  0xb3   :  { %v1363_v27 = vpop.permute.xlu0 %191 }
  0xb4   :  { %v1369_v30 = vpop.permute.xlu1 %206 }
  0xb7   :  { %v1367_v29 = vpop.permute.xlu0 %201 }
  0xba   :  { %v1373_v34 = vpop.permute.xlu1 %216 }
  0xbb   :  { %v1371_v31 = vpop.permute.xlu0 %211 }
  0xbe   :  { %v227_v46 = vpop.permute.xlu1 %226 }
  0xbf   :  { %v222_v37 = vpop.permute.xlu0 %221 }
  0xc2   :  { %v237_v8 = vpop.permute.xlu1 %236 }
  0xc3   :  { %v232_v59 = vpop.permute.xlu0 %231 }
  0xfd   :  { %v1043_v32 = vpop.f32.mrf.mxu0  ;;  %v1091_v33 = vpop.f32.mrf.mxu1 }
  0xff   :  { %v1044_v35 = vpop.f32.mrf.mxu0  ;;  %v1092_v36 = vpop.f32.mrf.mxu1 }
 0x100   :  { %v1045_v38 = vadd.f32 %v1044_v35, %v1043_v32  ;;  %v1093_v39 = vadd.f32 %v1092_v36, %v1091_v33  ;;  %v242_v33 = vpop.permute.xlu0 %241 }
 0x101   :  { %v1046_v40 = vpop.f32.mrf.mxu0  ;;  %v1094_v41 = vpop.f32.mrf.mxu1 }
 0x102   :  { %v590_v42 = vadd.f32 %v1045_v38, %v142_v17  ;;  %v654_v43 = vadd.f32 %v1093_v39, %v222_v37 }
 0x103   :  { %v1047_v44 = vpop.f32.mrf.mxu0  ;;  %v1095_v45 = vpop.f32.mrf.mxu1 }
 0x104   :  { %v716_v47 = vmax.f32 %v590_v42, 0.0  ;;  %v732_v48 = vmax.f32 %v654_v43, 0.0  ;;  %v1048_v49 = vadd.f32 %v1047_v44, %v1046_v40  ;;  %v1096_v50 = vadd.f32 %v1095_v45, %v1094_v41 }
 0x105   :  { %v1049_v51 = vpop.f32.mrf.mxu0  ;;  %v1097_v52 = vpop.f32.mrf.mxu1 }
 0x106   :  { %v995_v53 = vpack.c.bf16 %v716_v47, %v716_v47  ;;  %v1011_v54 = vpack.c.bf16 %v732_v48, %v732_v48  ;;  %v593_v55 = vadd.f32 %v1048_v49, %v147_v19  ;;  %v657_v56 = vadd.f32 %v1096_v50, %v227_v46  ;;  %v247_v46 = vpop.permute.xlu1 %246 }
 0x107   :  { %v1050_v57 = vpop.f32.mrf.mxu0  ;;  %v1098_v58 = vpop.f32.mrf.mxu1 }
 0x108   :  { %877 = vst.msk [vmem:[%s1519_s3] sm:$0xf] %vm876_vm0, %v995_v53  ;;  %893 = vst.msk [vmem:[%s1519_s3 + $0x40] sm:$0xf] %vm876_vm0, %v1011_v54  ;;  %v717_v60 = vmax.f32 %v593_v55, 0.0  ;;  %v733_v61 = vmax.f32 %v657_v56, 0.0  ;;  %v1051_v62 = vadd.f32 %v1050_v57, %v1049_v51  ;;  %v1099_v63 = vadd.f32 %v1098_v58, %v1097_v52  ;;  %v252_v58 = vpop.permute.xlu0 %251 }
 0x109   :  { %v1052_v0 = vpop.f32.mrf.mxu0  ;;  %v1100_v1 = vpop.f32.mrf.mxu1 }
 0x10a   :  { %v996_v2 = vpack.c.bf16 %v717_v60, %v717_v60  ;;  %v1012_v3 = vpack.c.bf16 %v733_v61, %v733_v61  ;;  %v598_v4 = vadd.f32 %v1051_v62, %v152_v18  ;;  %v662_v5 = vadd.f32 %v1099_v63, %v232_v59 }
 0x10b   :  { %v1053_v6 = vpop.f32.mrf.mxu0  ;;  %v1101_v7 = vpop.f32.mrf.mxu1 }
 0x10c   :  { %878 = vst.msk [vmem:[%s1519_s3 + $0x4] sm:$0xf] %vm876_vm0, %v996_v2  ;;  %894 = vst.msk [vmem:[%s1519_s3 + $0x44] sm:$0xf] %vm876_vm0, %v1012_v3  ;;  %v718_v9 = vmax.f32 %v598_v4, 0.0  ;;  %v734_v10 = vmax.f32 %v662_v5, 0.0  ;;  %v1054_v11 = vadd.f32 %v1053_v6, %v1052_v0  ;;  %v1102_v12 = vadd.f32 %v1101_v7, %v1100_v1  ;;  %v257_v6 = vpop.permute.xlu1 %256 }
 0x10d   :  { %v1055_v13 = vpop.f32.mrf.mxu0  ;;  %v1103_v14 = vpop.f32.mrf.mxu1 }
 0x10e   :  { %v997_v15 = vpack.c.bf16 %v718_v9, %v718_v9  ;;  %v1013_v16 = vpack.c.bf16 %v734_v10, %v734_v10  ;;  %v601_v17 = vadd.f32 %v1054_v11, %v1349_v20  ;;  %v665_v18 = vadd.f32 %v1102_v12, %v237_v8 }
 0x10f   :  { %v1056_v19 = vpop.f32.mrf.mxu0  ;;  %v1104_v32 = vpop.f32.mrf.mxu1 }
 0x110   :  { %879 = vst.msk [vmem:[%s1519_s3 + $0x8] sm:$0xf] %vm876_vm0, %v997_v15  ;;  %895 = vst.msk [vmem:[%s1519_s3 + $0x48] sm:$0xf] %vm876_vm0, %v1013_v16  ;;  %v719_v35 = vmax.f32 %v601_v17, 0.0  ;;  %v735_v36 = vmax.f32 %v665_v18, 0.0  ;;  %v1057_v37 = vadd.f32 %v1056_v19, %v1055_v13  ;;  %v1105_v38 = vadd.f32 %v1104_v32, %v1103_v14  ;;  %v262_v18 = vpop.permute.xlu0 %261 }
 0x111   :  { %v1058_v39 = vpop.f32.mrf.mxu0  ;;  %v1106_v20 = vpop.f32.mrf.mxu1 }
 0x112   :  { %v998_v40 = vpack.c.bf16 %v719_v35, %v719_v35  ;;  %v1014_v41 = vpack.c.bf16 %v735_v36, %v735_v36  ;;  %v606_v42 = vadd.f32 %v1057_v37, %v1351_v21  ;;  %v670_v43 = vadd.f32 %v1105_v38, %v242_v33 }
 0x113   :  { %v1059_v44 = vpop.f32.mrf.mxu0  ;;  %v1107_v45 = vpop.f32.mrf.mxu1 }
 0x114   :  { %880 = vst.msk [vmem:[%s1519_s3 + $0xc] sm:$0xf] %vm876_vm0, %v998_v40  ;;  %896 = vst.msk [vmem:[%s1519_s3 + $0x4c] sm:$0xf] %vm876_vm0, %v1014_v41  ;;  %v720_v47 = vmax.f32 %v606_v42, 0.0  ;;  %v736_v48 = vmax.f32 %v670_v43, 0.0  ;;  %v1060_v49 = vadd.f32 %v1059_v44, %v1058_v39  ;;  %v1108_v50 = vadd.f32 %v1107_v45, %v1106_v20  ;;  %v267_v42 = vpop.permute.xlu1 %266 }
 0x115   :  { %v1061_v51 = vpop.f32.mrf.mxu0  ;;  %v1109_v21 = vpop.f32.mrf.mxu1 }
 0x116   :  { %v999_v52 = vpack.c.bf16 %v720_v47, %v720_v47  ;;  %v1015_v53 = vpack.c.bf16 %v736_v48, %v736_v48  ;;  %v609_v54 = vadd.f32 %v1060_v49, %v1353_v22  ;;  %v673_v55 = vadd.f32 %v1108_v50, %v247_v46 }
 0x117   :  { %v1062_v56 = vpop.f32.mrf.mxu0  ;;  %v1110_v57 = vpop.f32.mrf.mxu1 }
 0x118   :  { %881 = vst.msk [vmem:[%s1519_s3 + $0x10] sm:$0xf] %vm876_vm0, %v999_v52  ;;  %897 = vst.msk [vmem:[%s1519_s3 + $0x50] sm:$0xf] %vm876_vm0, %v1015_v53  ;;  %v721_v59 = vmax.f32 %v609_v54, 0.0  ;;  %v737_v60 = vmax.f32 %v673_v55, 0.0  ;;  %v1063_v61 = vadd.f32 %v1062_v56, %v1061_v51  ;;  %v1111_v62 = vadd.f32 %v1110_v57, %v1109_v21  ;;  %v272_v53 = vpop.permute.xlu0 %271 }
 0x119   :  { %v1064_v63 = vpop.f32.mrf.mxu0  ;;  %v1112_v22 = vpop.f32.mrf.mxu1 }
 0x11a   :  { %v1000_v0 = vpack.c.bf16 %v721_v59, %v721_v59  ;;  %v1016_v1 = vpack.c.bf16 %v737_v60, %v737_v60  ;;  %v614_v2 = vadd.f32 %v1063_v61, %v1355_v23  ;;  %v678_v3 = vadd.f32 %v1111_v62, %v252_v58 }
 0x11b   :  { %v1065_v4 = vpop.f32.mrf.mxu0  ;;  %v1113_v5 = vpop.f32.mrf.mxu1 }
 0x11c   :  { %882 = vst.msk [vmem:[%s1519_s3 + $0x14] sm:$0xf] %vm876_vm0, %v1000_v0  ;;  %898 = vst.msk [vmem:[%s1519_s3 + $0x54] sm:$0xf] %vm876_vm0, %v1016_v1  ;;  %v722_v7 = vmax.f32 %v614_v2, 0.0  ;;  %v738_v8 = vmax.f32 %v678_v3, 0.0  ;;  %v1066_v9 = vadd.f32 %v1065_v4, %v1064_v63  ;;  %v1114_v10 = vadd.f32 %v1113_v5, %v1112_v22  ;;  %v277_v0 = vpop.permute.xlu1 %276 }
 0x11d   :  { %v1067_v11 = vpop.f32.mrf.mxu0  ;;  %v1115_v23 = vpop.f32.mrf.mxu1 }
 0x11e   :  { %v1001_v12 = vpack.c.bf16 %v722_v7, %v722_v7  ;;  %v1017_v13 = vpack.c.bf16 %v738_v8, %v738_v8  ;;  %v617_v14 = vadd.f32 %v1066_v9, %v1357_v24  ;;  %v681_v15 = vadd.f32 %v1114_v10, %v257_v6 }
 0x11f   :  { %v1068_v16 = vpop.f32.mrf.mxu0  ;;  %v1116_v17 = vpop.f32.mrf.mxu1 }
 0x120   :  { %883 = vst.msk [vmem:[%s1519_s3 + $0x18] sm:$0xf] %vm876_vm0, %v1001_v12  ;;  %899 = vst.msk [vmem:[%s1519_s3 + $0x58] sm:$0xf] %vm876_vm0, %v1017_v13  ;;  %v723_v19 = vmax.f32 %v617_v14, 0.0  ;;  %v739_v32 = vmax.f32 %v681_v15, 0.0  ;;  %v1069_v33 = vadd.f32 %v1068_v16, %v1067_v11  ;;  %v1117_v35 = vadd.f32 %v1116_v17, %v1115_v23  ;;  %v282_v23 = vpop.permute.xlu0 %281 }
 0x121   :  { %v1070_v36 = vpop.f32.mrf.mxu0  ;;  %v1118_v24 = vpop.f32.mrf.mxu1 }
 0x122   :  { %v1002_v37 = vpack.c.bf16 %v723_v19, %v723_v19  ;;  %v1018_v38 = vpack.c.bf16 %v739_v32, %v739_v32  ;;  %v622_v39 = vadd.f32 %v1069_v33, %v1359_v25  ;;  %v686_v20 = vadd.f32 %v1117_v35, %v262_v18 }
 0x123   :  { %v1071_v40 = vpop.f32.mrf.mxu0  ;;  %v1119_v41 = vpop.f32.mrf.mxu1 }
 0x124   :  { %884 = vst.msk [vmem:[%s1519_s3 + $0x1c] sm:$0xf] %vm876_vm0, %v1002_v37  ;;  %900 = vst.msk [vmem:[%s1519_s3 + $0x5c] sm:$0xf] %vm876_vm0, %v1018_v38  ;;  %v724_v43 = vmax.f32 %v622_v39, 0.0  ;;  %v740_v44 = vmax.f32 %v686_v20, 0.0  ;;  %v1072_v45 = vadd.f32 %v1071_v40, %v1070_v36  ;;  %v1120_v46 = vadd.f32 %v1119_v41, %v1118_v24  ;;  %v287_v36 = vpop.permute.xlu1 %286 }
 0x125   :  { %v1073_v47 = vpop.f32.mrf.mxu0  ;;  %v1121_v25 = vpop.f32.mrf.mxu1 }
 0x126   :  { %v1003_v48 = vpack.c.bf16 %v724_v43, %v724_v43  ;;  %v1019_v49 = vpack.c.bf16 %v740_v44, %v740_v44  ;;  %v625_v50 = vadd.f32 %v1072_v45, %v1361_v26  ;;  %v689_v51 = vadd.f32 %v1120_v46, %v267_v42  ;;  %v292_v46 = vpop.permute.xlu0 %291 }
 0x127   :  { %v1074_v21 = vpop.f32.mrf.mxu0  ;;  %v1122_v52 = vpop.f32.mrf.mxu1 }
 0x128   :  { %885 = vst.msk [vmem:[%s1519_s3 + $0x20] sm:$0xf] %vm876_vm0, %v1003_v48  ;;  %901 = vst.msk [vmem:[%s1519_s3 + $0x60] sm:$0xf] %vm876_vm0, %v1019_v49  ;;  %v725_v54 = vmax.f32 %v625_v50, 0.0  ;;  %v741_v55 = vmax.f32 %v689_v51, 0.0  ;;  %v1075_v56 = vadd.f32 %v1074_v21, %v1073_v47  ;;  %v1123_v57 = vadd.f32 %v1122_v52, %v1121_v25 }
 0x129   :  { %v1076_v58 = vpop.f32.mrf.mxu0  ;;  %v1124_v26 = vpop.f32.mrf.mxu1 }
 0x12a   :  { %v1004_v59 = vpack.c.bf16 %v725_v54, %v725_v54  ;;  %v1020_v60 = vpack.c.bf16 %v741_v55, %v741_v55  ;;  %v630_v61 = vadd.f32 %v1075_v56, %v1363_v27  ;;  %v694_v62 = vadd.f32 %v1123_v57, %v272_v53 }
 0x12b   :  { %v1077_v63 = vpop.f32.mrf.mxu0  ;;  %v1125_v22 = vpop.f32.mrf.mxu1 }
 0x12c   :  { %886 = vst.msk [vmem:[%s1519_s3 + $0x24] sm:$0xf] %vm876_vm0, %v1004_v59  ;;  %902 = vst.msk [vmem:[%s1519_s3 + $0x64] sm:$0xf] %vm876_vm0, %v1020_v60  ;;  %v726_v1 = vmax.f32 %v630_v61, 0.0  ;;  %v742_v2 = vmax.f32 %v694_v62, 0.0  ;;  %v1078_v3 = vadd.f32 %v1077_v63, %v1076_v58  ;;  %v1126_v4 = vadd.f32 %v1125_v22, %v1124_v26  ;;  %v297_v59 = vpop.permute.xlu1 %296 }
 0x12d   :  { %v1079_v5 = vpop.f32.mrf.mxu0  ;;  %v1127_v27 = vpop.f32.mrf.mxu1 }
 0x12e   :  { %v1005_v6 = vpack.c.bf16 %v726_v1, %v726_v1  ;;  %v1021_v7 = vpack.c.bf16 %v742_v2, %v742_v2  ;;  %v633_v8 = vadd.f32 %v1078_v3, %v1365_v28  ;;  %v697_v9 = vadd.f32 %v1126_v4, %v277_v0 }
 0x12f   :  { %v1080_v10 = vpop.f32.mrf.mxu0  ;;  %v1128_v11 = vpop.f32.mrf.mxu1 }
 0x130   :  { %887 = vst.msk [vmem:[%s1519_s3 + $0x28] sm:$0xf] %vm876_vm0, %v1005_v6  ;;  %903 = vst.msk [vmem:[%s1519_s3 + $0x68] sm:$0xf] %vm876_vm0, %v1021_v7  ;;  %v727_v12 = vmax.f32 %v633_v8, 0.0  ;;  %v743_v13 = vmax.f32 %v697_v9, 0.0  ;;  %v1081_v14 = vadd.f32 %v1080_v10, %v1079_v5  ;;  %v1129_v15 = vadd.f32 %v1128_v11, %v1127_v27 }
 0x131   :  { %v1082_v16 = vpop.f32.mrf.mxu0  ;;  %v1130_v28 = vpop.f32.mrf.mxu1 }
 0x132   :  { %v1006_v17 = vpack.c.bf16 %v727_v12, %v727_v12  ;;  %v1022_v18 = vpack.c.bf16 %v743_v13, %v743_v13  ;;  %v638_v19 = vadd.f32 %v1081_v14, %v1367_v29  ;;  %v702_v32 = vadd.f32 %v1129_v15, %v282_v23 }
 0x133   :  { %v1083_v33 = vpop.f32.mrf.mxu0  ;;  %v1131_v35 = vpop.f32.mrf.mxu1 }
 0x134   :  { %888 = vst.msk [vmem:[%s1519_s3 + $0x2c] sm:$0xf] %vm876_vm0, %v1006_v17  ;;  %904 = vst.msk [vmem:[%s1519_s3 + $0x6c] sm:$0xf] %vm876_vm0, %v1022_v18  ;;  %v728_v24 = vmax.f32 %v638_v19, 0.0  ;;  %v744_v37 = vmax.f32 %v702_v32, 0.0  ;;  %v1084_v38 = vadd.f32 %v1083_v33, %v1082_v16  ;;  %v1132_v39 = vadd.f32 %v1131_v35, %v1130_v28 }
 0x135   :  { %v1085_v20 = vpop.f32.mrf.mxu0  ;;  %v1133_v29 = vpop.f32.mrf.mxu1 }
 0x136   :  { %v1007_v40 = vpack.c.bf16 %v728_v24, %v728_v24  ;;  %v1023_v41 = vpack.c.bf16 %v744_v37, %v744_v37  ;;  %v641_v42 = vadd.f32 %v1084_v38, %v1369_v30  ;;  %v705_v43 = vadd.f32 %v1132_v39, %v287_v36 }
 0x137   :  { %v1086_v44 = vpop.f32.mrf.mxu0  ;;  %v1134_v45 = vpop.f32.mrf.mxu1 }
 0x138   :  { %889 = vst.msk [vmem:[%s1519_s3 + $0x30] sm:$0xf] %vm876_vm0, %v1007_v40  ;;  %905 = vst.msk [vmem:[%s1519_s3 + $0x70] sm:$0xf] %vm876_vm0, %v1023_v41  ;;  %v729_v47 = vmax.f32 %v641_v42, 0.0  ;;  %v745_v25 = vmax.f32 %v705_v43, 0.0  ;;  %v1087_v48 = vadd.f32 %v1086_v44, %v1085_v20  ;;  %v1135_v49 = vadd.f32 %v1134_v45, %v1133_v29 }
 0x139   :  { %v1088_v50 = vpop.f32.mrf.mxu0  ;;  %v1136_v30 = vpop.f32.mrf.mxu1 }
 0x13a   :  { %v1008_v51 = vpack.c.bf16 %v729_v47, %v729_v47  ;;  %v1024_v21 = vpack.c.bf16 %v745_v25, %v745_v25  ;;  %v646_v52 = vadd.f32 %v1087_v48, %v1371_v31  ;;  %v710_v53 = vadd.f32 %v1135_v49, %v292_v46 }
 0x13b   :  { %v1089_v54 = vpop.f32.mrf.mxu0  ;;  %v1137_v55 = vpop.f32.mrf.mxu1 }
 0x13c   :  { %890 = vst.msk [vmem:[%s1519_s3 + $0x34] sm:$0xf] %vm876_vm0, %v1008_v51  ;;  %906 = vst.msk [vmem:[%s1519_s3 + $0x74] sm:$0xf] %vm876_vm0, %v1024_v21  ;;  %v730_v56 = vmax.f32 %v646_v52, 0.0  ;;  %v746_v57 = vmax.f32 %v710_v53, 0.0  ;;  %v1090_v58 = vadd.f32 %v1089_v54, %v1088_v50  ;;  %v1138_v26 = vadd.f32 %v1137_v55, %v1136_v30 }
 0x13e   :  { %v1009_v60 = vpack.c.bf16 %v730_v56, %v730_v56  ;;  %v1025_v31 = vpack.c.bf16 %v746_v57, %v746_v57  ;;  %v649_v61 = vadd.f32 %v1090_v58, %v1373_v34  ;;  %v713_v62 = vadd.f32 %v1138_v26, %v297_v59 }
 0x140   :  { %891 = vst.msk [vmem:[%s1519_s3 + $0x38] sm:$0xf] %vm876_vm0, %v1009_v60  ;;  %907 = vst.msk [vmem:[%s1519_s3 + $0x78] sm:$0xf] %vm876_vm0, %v1025_v31  ;;  %v731_v63 = vmax.f32 %v649_v61, 0.0  ;;  %v747_v22 = vmax.f32 %v713_v62, 0.0 }
 0x142   :  { %v1010_v0 = vpack.c.bf16 %v731_v63, %v731_v63  ;;  %v1026_v1 = vpack.c.bf16 %v747_v22, %v747_v22 }
 0x144   :  { %892 = vst.msk [vmem:[%s1519_s3 + $0x3c] sm:$0xf] %vm876_vm0, %v1010_v0  ;;  %908 = vst.msk [vmem:[%s1519_s3 + $0x7c] sm:$0xf] %vm876_vm0, %v1026_v1 }
 0x145   :  { %913 = vsyncpa [#allocation3], 1 }
 0x146   :  { %914 = vsyncpa [#allocation5], 1 }

// kernel: forward.6
= control target key start
LH: loop header
LB: loop body
LE: loop exit
PB: predicated region body
PF: predicated region fallthrough
CT: control target
= control target key end

     0   :  { %8 = vsyncpa [#allocation3], 0  ;;  %s1199_s0 = inlined_call_operand.hbm [shape: bf16[64,128], index: 0, kind: input, shape index: {}]   ;;  %s1200_s1 = inlined_call_operand.vmem [shape: bf16[128,512], index: 1, kind: input, shape index: {}]   ;;  %s1201_s2 = inlined_call_operand.hbm [shape: f32[64,1], index: 2, kind: input, shape index: {}]   ;;  %s1202_s3 = inlined_call_operand.vmem [shape: bf16[64,512], index: 3, kind: output, shape index: {}]  }
   0x1   :  { %9 = vsyncpa [#allocation6], 0  ;;  %s1028_s12 = smov 0   ;;  %s1030_s13 = smov 0  }
   0x2   :  { %s1032_s14 = smov 0  }
   0x3 LB: > { %s1044_s15 = sadd.s32 4294967295, %s999_s14   ;;  %s1047_s16 = sadd.s32 1, %s999_s14   ;;  %s999_s14 = sphi %s1032_s14, %s1215_s14   ;;  %s995_s13 = sphi %s1030_s13, %s1214_s13   ;;  %s991_s12 = sphi %s1028_s12, %s1213_s12  }
   0x4   : > { %s40_s17 = ssub.s32 %s999_s14, %s1047_s16  ;;  %s43_s18 = sadd.s32 1, %s995_s13 }
   0x5   : > { %p41_p0 = scmp.eq.s32.totalorder %s40_s17, 0  ;;  %p50_p1 = scmp.ne.s32.totalorder %s995_s13, %s991_s12 }
   0x6   : > { %p51_p2 = scmp.eq.s32.totalorder %s999_s14, 0  ;;  %p101_p3 = scmp.eq.s32.totalorder %s1044_s15, 1 }
   0x7   : > { %s1057_s19 = scalar_select %p41_p0, %s995_s13, %s43_s18  }
   0x8   : > { %p1059_p4 = por %p51_p2, %p50_p1  ;;  %p1063_p5 = por %p101_p3, %p50_p1 }
   0x9   : > { %p766_p6 = scmp.ge.s32.totalorder %s999_s14, 1  ;;  %p114_p7 = scmp.lt.s32.totalorder %s999_s14, 3 }
   0xa   : > { %s1205_s21 = scalar_select %p1063_p5, 1, 0 }
   0xb   : > { %p1203_p8 = scmp.eq.s32.totalorder %s1044_s15, 0  ;;  %p1070_p9 = pnand %p766_p6, %p114_p7 }
   0xc   : > { %s1001_s23 = smov [#allocation2]   ;;  %s1002_s26 = smov [#allocation5]  }
   0xd   : > { %s126_s24 = sshll.u32 %s1001_s23, 4  ;;  %p845_p10 = pneg %p1070_p9  ;;  %s127_s24 = int_to_ptr.vmem [resolvable:$true] %s126_s24 }
   0xe   : > { %s139_s27 = sshll.u32 %s1002_s26, 4  ;;  %s928_s28 = scalar_lea.vmem %s127_s24, 512  ;;  %s140_s27 = int_to_ptr.vmem [resolvable:$true] %s139_s27 }
   0xf   : > { %p1078_p11 = pnand %p1203_p8, %p845_p10  ;;  %p929_p13 = scmp.ne.s32.totalorder %s127_s24, %s928_s28 }
  0x10   : > { %p936_p2 = scmp.lt.s32.totalorder %s127_s24, %s127_s24  ;;  %p937_p3 = scmp.lt.s32.totalorder %s928_s28, %s928_s28 }
  0x11   : > { %p919_p12 = pneg %p1078_p11 }
  0x12   : > { %p938_p6 = por %p937_p3, %p936_p2 }
  0x13   : > { %p931_p0 = pnand %p929_p13, %p919_p12 }
  0x15   : > { %p932_p1 = pneg %p931_p0 }
  0x17   : > { %p939_p7 = pnand %p938_p6, %p932_p1 }
  0x19   : > { %942 = shalt.err (!%p939_p7)
}
  0x1a   : > { %s1003_s29 = smov 64   ;;  %s1004_s30 = smov 4  }
  0x1b   : > { %848 = dma.hbm_to_vmem [thread:$0]  (!%p1078_p11), %s1199_s0, 512, %s127_s24, [#allocation3], %s1003_s29, %s1003_s29, %s1004_s30  }
  0x1c   : > { %s954_s6 = scalar_lea.vmem %s140_s27, 1024  ;;  %p962_p8 = scmp.lt.s32.totalorder %s140_s27, %s140_s27 }
  0x1d   : > { %p955_p10 = scmp.ne.s32.totalorder %s140_s27, %s954_s6  ;;  %p963_p5 = scmp.lt.s32.totalorder %s954_s6, %s954_s6 }
  0x1f   : > { %p957_p13 = pnand %p955_p10, %p919_p12  ;;  %p964_p2 = por %p963_p5, %p962_p8 }
  0x21   : > { %p958_p0 = pneg %p957_p13 }
  0x23   : > { %p965_p1 = pnand %p964_p2, %p958_p0 }
  0x25   : > { %968 = shalt.err (!%p965_p1)
}
  0x26   : > { %s1005_s7 = smov 128   ;;  %s1006_s8 = smov 8  }
  0x27   : > { %851 = dma.hbm_to_vmem [thread:$0]  (!%p1078_p11), %s1201_s2, 1024, %s140_s27, [#allocation6], %s1005_s7, %s1005_s7, %s1006_s8  }
  0x28   : > { %p769_p3 = scmp.ge.s32.totalorder %s999_s14, 2 }
  0x2a   : > { %149 = sbr.rel (%p769_p3) target bundleno = 59 (0x3b), region = 24 }
  0x2f   : > { %152 = sbr.rel (!%p1059_p4) target bundleno = 59 (0x3b), region = 28  ;;  %s154_s11 = sand.u32 (%p1059_p4), 1, %s995_s13  }
  0x30   : > { %s811_s17 = sshll.u32 (%p1059_p4), %s999_s14, 3  ;;  %s770_s18 = sshll.u32 (%p1059_p4), %s154_s11, 7 }
  0x31   : > { %s1108_s26 = scalar_lea.vmem (%p1059_p4), %s1200_s1, %s811_s17  ;;  %s156_s20 = scalar_lea.vmem (%p1059_p4), [#allocation4], %s770_s18 }
  0x32   : > { %v218_v0 = vld [vmem:[%s1108_s26] sm:$0xff] (%p1059_p4)  ;;  %v220_v1 = vld [vmem:[%s1108_s26 + $0x10] sm:$0xff] (%p1059_p4) }
  0x33   : > { %v222_v2 = vld [vmem:[%s1108_s26 + $0x20] sm:$0xff] (%p1059_p4)  ;;  %219 = vst [vmem:[%s156_s20] sm:$0xff] (%p1059_p4), %v218_v0  ;;  %221 = vst [vmem:[%s156_s20 + $0x8] sm:$0xff] (%p1059_p4), %v220_v1  ;;  %v224_v3 = vld [vmem:[%s1108_s26 + $0x30] sm:$0xff] (%p1059_p4) }
  0x34   : > { %223 = vst [vmem:[%s156_s20 + $0x10] sm:$0xff] %v222_v2  ;;  %v226_v4 = vld [vmem:[%s1108_s26 + $0x40] sm:$0xff]  ;;  %v228_v5 = vld [vmem:[%s1108_s26 + $0x50] sm:$0xff]  ;;  %225 = vst [vmem:[%s156_s20 + $0x18] sm:$0xff] %v224_v3 }
  0x35   : > { %227 = vst [vmem:[%s156_s20 + $0x20] sm:$0xff] %v226_v4  ;;  %229 = vst [vmem:[%s156_s20 + $0x28] sm:$0xff] %v228_v5  ;;  %v230_v6 = vld [vmem:[%s1108_s26 + $0x60] sm:$0xff]  ;;  %v232_v7 = vld [vmem:[%s1108_s26 + $0x70] sm:$0xff] }
  0x36   : > { %v234_v8 = vld [vmem:[%s1108_s26 + $0x80] sm:$0xff]  ;;  %231 = vst [vmem:[%s156_s20 + $0x30] sm:$0xff] %v230_v6  ;;  %233 = vst [vmem:[%s156_s20 + $0x38] sm:$0xff] %v232_v7  ;;  %v236_v9 = vld [vmem:[%s1108_s26 + $0x90] sm:$0xff] }
  0x37   : > { %235 = vst [vmem:[%s156_s20 + $0x40] sm:$0xff] %v234_v8  ;;  %v238_v10 = vld [vmem:[%s1108_s26 + $0xa0] sm:$0xff]  ;;  %v240_v11 = vld [vmem:[%s1108_s26 + $0xb0] sm:$0xff]  ;;  %237 = vst [vmem:[%s156_s20 + $0x48] sm:$0xff] %v236_v9 }
  0x38   : > { %239 = vst [vmem:[%s156_s20 + $0x50] sm:$0xff] %v238_v10  ;;  %241 = vst [vmem:[%s156_s20 + $0x58] sm:$0xff] %v240_v11  ;;  %v242_v12 = vld [vmem:[%s1108_s26 + $0xc0] sm:$0xff]  ;;  %v244_v13 = vld [vmem:[%s1108_s26 + $0xd0] sm:$0xff] }
  0x39   : > { %v246_v14 = vld [vmem:[%s1108_s26 + $0xe0] sm:$0xff]  ;;  %243 = vst [vmem:[%s156_s20 + $0x60] sm:$0xff] %v242_v12  ;;  %245 = vst [vmem:[%s156_s20 + $0x68] sm:$0xff] %v244_v13  ;;  %v248_v15 = vld [vmem:[%s1108_s26 + $0xf0] sm:$0xff] }
  0x3a   : > { %247 = vst [vmem:[%s156_s20 + $0x70] sm:$0xff] %v246_v14  ;;  %249 = vst [vmem:[%s156_s20 + $0x78] sm:$0xff] %v248_v15 }
  0x3b PF: > { %258 = sbr.rel (%p1070_p9) target bundleno = 327 (0x147), region = 66  ;;  %p1208_p4 = scmp.eq.s32.totalorder (!%p1070_p9), %s1044_s15, 0 }
  0x40   : > { %982 = dma.done.wait (%p1208_p4), [#allocation3], 512   ;;  %p1209_p5 = pmov %p1208_p4 }
  0x41   : > { %s265_s14 = sand.u32 1, %s991_s12   ;;  %p1210_p8 = pmov %p1208_p4 }
  0x42   : > { %984 = vsyncadd (%p1209_p5), [#allocation3], 4294966784  ;;  %s775_s25 = sshll.u32 %s265_s14, 7 }
  0x43   : > { %s1135_s27 = scalar_lea.vmem [#allocation4], %s775_s25 }
  0x44   : > { %986 = dma.done.wait (%p1210_p8), [#allocation6], 1024   ;;  %p1211_p11 = pmov %p1208_p4 }
  0x45   : > { %v1007_v16 = vmov 0   ;;  %v889_v17 = vld [vmem:[%s1135_s27 + $0x74] ss:$8 sps:$4 sm:$0xff]   ;;  %v891_v18 = vld [vmem:[%s1135_s27 + $0x70] ss:$8 sps:$4 sm:$0xff]   ;;  %v318_v28 = vld [vmem:[#allocation5] sm:$0xff] }
  0x46   : > { %988 = vsyncadd (%p1211_p11), [#allocation6], 4294966272  ;;  %502 = vmatprep.mubr.bf16.mxu0 %v1007_v16  ;;  %522 = vmatprep.mubr.bf16.mxu1 %v1007_v16  ;;  %v892_v19 = vld [vmem:[%s1135_s27 + $0x64] ss:$8 sps:$4 sm:$0xff]   ;;  %v894_v20 = vld [vmem:[%s1135_s27 + $0x60] ss:$8 sps:$4 sm:$0xff]  }
  0x47   : > { %888 = vset.pattern.permute.xlu1 %v1007_v16  ;;  %887 = vset.pattern.permute.xlu0 %v1007_v16  ;;  %v895_v21 = vld [vmem:[%s1135_s27 + $0x54] ss:$8 sps:$4 sm:$0xff]   ;;  %v897_v22 = vld [vmem:[%s1135_s27 + $0x50] ss:$8 sps:$4 sm:$0xff]   ;;  %v898_v23 = vld [vmem:[%s1135_s27 + $0x44] ss:$8 sps:$4 sm:$0xff]  }
  0x48   : > { %470 = vmatprep.subr.bf16.mxu0 %v889_v17  ;;  %821 = vmatprep.subr.bf16.mxu1 %v889_v17  ;;  %v900_v24 = vld [vmem:[%s1135_s27 + $0x40] ss:$8 sps:$4 sm:$0xff]   ;;  %v901_v25 = vld [vmem:[%s1135_s27 + $0x34] ss:$8 sps:$4 sm:$0xff]   ;;  %v903_v27 = vld [vmem:[%s1135_s27 + $0x30] ss:$8 sps:$4 sm:$0xff]  }
  0x49   : > { %471 = vmatpush1.bf16.msra.mxu0 %v891_v18  ;;  %829 = vmatpush1.bf16.msra.mxu1 %v891_v18  ;;  %v320_v26 = vld [vmem:[#allocation5 + $0x10] sm:$0xff]  ;;  %v904_v29 = vld [vmem:[%s1135_s27 + $0x24] ss:$8 sps:$4 sm:$0xff]   ;;  %v321_v30 = vld [vmem:[#allocation5 + $0x18] sm:$0xff]  ;;  %s777_s22 = sshll.u32 %s265_s14, 6  ;;  %p1212_p9 = scmp.ne.s32.totalorder %s1205_s21, 0 }
  0x4a   : > { %472 = vmatprep.subr.bf16.mxu0 %v892_v19  ;;  %822 = vmatprep.subr.bf16.mxu1 %v892_v19  ;;  %v319_v31 = vld [vmem:[#allocation5 + $0x8] sm:$0xff]  ;;  %v907_v33 = vld [vmem:[%s1135_s27 + $0x14] ss:$8 sps:$4 sm:$0xff]   ;;  %v322_v35 = vld [vmem:[#allocation5 + $0x20] sm:$0xff]  ;;  %s1165_s12 = scalar_lea.vmem [#allocation7], %s777_s22  ;;  %s820_s28 = sshll.u32 (%p1212_p9), %s1044_s15, 3 }
  0x4b   : > { %338 = vperm.xlu1 %888, %v320_v26   ;;  %328 = vperm.xlu0 %887, %v318_v28   ;;  %v906_v32 = vld [vmem:[%s1135_s27 + $0x20] ss:$8 sps:$4 sm:$0xff]   ;;  %v909_v36 = vld [vmem:[%s1135_s27 + $0x10] ss:$8 sps:$4 sm:$0xff]   ;;  %v910_v37 = vld [vmem:[%s1135_s27 + $0x4] ss:$8 sps:$4 sm:$0xff]   ;;  %s624_s4 = scalar_lea.vmem (%p1212_p9), %s1202_s3, %s820_s28 }
  0x4c   : > { %v323_v34 = vld [vmem:[#allocation5 + $0x28] sm:$0xff]  ;;  %v325_v38 = vld [vmem:[#allocation5 + $0x38] sm:$0xff]  ;;  %v324_v39 = vld [vmem:[#allocation5 + $0x30] sm:$0xff] }
  0x4d   : > { %473 = vmatpush1.bf16.msra.mxu0 %v894_v20  ;;  %830 = vmatpush1.bf16.msra.mxu1 %v894_v20  ;;  %v912_v40 = vld [vmem:[%s1135_s27] ss:$8 sps:$4 sm:$0xff]   ;;  %v914_v42 = vld [vmem:[#allocation2 + $0x10] sm:$0xff]   ;;  %v916_v44 = vld [vmem:[#allocation2 + $0x18] sm:$0xff]  }
  0x4e   : > { %474 = vmatprep.subr.bf16.mxu0 %v895_v21  ;;  %823 = vmatprep.subr.bf16.mxu1 %v895_v21  ;;  %v913_v41 = vld [vmem:[#allocation2] sm:$0xff]   ;;  %v915_v43 = vld [vmem:[#allocation2 + $0x8] sm:$0xff]  }
  0x4f   : > { %343 = vperm.xlu1 %888, %v321_v30   ;;  %333 = vperm.xlu0 %887, %v319_v31  }
  0x51   : > { %475 = vmatpush1.bf16.msra.mxu0 %v897_v22  ;;  %831 = vmatpush1.bf16.msra.mxu1 %v897_v22 }
  0x52   : > { %476 = vmatprep.subr.bf16.mxu0 %v898_v23  ;;  %824 = vmatprep.subr.bf16.mxu1 %v898_v23 }
  0x53   : > { %353 = vperm.xlu1 %888, %v323_v34   ;;  %348 = vperm.xlu0 %887, %v322_v35  }
  0x55   : > { %477 = vmatpush1.bf16.msra.mxu0 %v900_v24  ;;  %832 = vmatpush1.bf16.msra.mxu1 %v900_v24 }
  0x56   : > { %478 = vmatprep.subr.bf16.mxu0 %v901_v25  ;;  %825 = vmatprep.subr.bf16.mxu1 %v901_v25 }
  0x57   : > { %363 = vperm.xlu1 %888, %v325_v38   ;;  %358 = vperm.xlu0 %887, %v324_v39  }
  0x59   : > { %479 = vmatpush1.bf16.msra.mxu0 %v903_v27  ;;  %833 = vmatpush1.bf16.msra.mxu1 %v903_v27 }
  0x5a   : > { %480 = vmatprep.subr.bf16.mxu0 %v904_v29  ;;  %826 = vmatprep.subr.bf16.mxu1 %v904_v29 }
  0x5d   : > { %481 = vmatpush1.bf16.msra.mxu0 %v906_v32  ;;  %834 = vmatpush1.bf16.msra.mxu1 %v906_v32 }
  0x5e   : > { %482 = vmatprep.subr.bf16.mxu0 %v907_v33  ;;  %827 = vmatprep.subr.bf16.mxu1 %v907_v33 }
  0x61   : > { %483 = vmatpush1.bf16.msra.mxu0 %v909_v36  ;;  %835 = vmatpush1.bf16.msra.mxu1 %v909_v36 }
  0x62   : > { %484 = vmatprep.subr.bf16.mxu0 %v910_v37  ;;  %828 = vmatprep.subr.bf16.mxu1 %v910_v37 }
  0x65   : > { %485 = vmatpush1.bf16.msra.mxu0 %v912_v40  ;;  %836 = vmatpush1.bf16.msra.mxu1 %v912_v40 }
  0x68   : > { %503 = vmatmul.mubr.bf16.vlgmr.msra.gmra.mxu0 %v913_v41  ;;  %523 = vmatmul.mubr.bf16.vlgmr.msra.gmra.mxu1 %v914_v42 }
  0x69   : > { %512 = vmatprep.mubr.bf16.mxu0 %v1007_v16  ;;  %532 = vmatprep.mubr.bf16.mxu1 %v1007_v16 }
  0x70   : > { %513 = vmatmul.mubr.bf16.gmra.mxu0 %v915_v43  ;;  %533 = vmatmul.mubr.bf16.gmra.mxu1 %v916_v44 }
  0xc6   : > { %v329_v45 = vpop.permute.xlu0 %328  ;;  %v339_v46 = vpop.permute.xlu1 %338 }
  0xca   : > { %v334_v47 = vpop.permute.xlu0 %333  ;;  %v344_v48 = vpop.permute.xlu1 %343 }
  0xce   : > { %v349_v49 = vpop.permute.xlu0 %348  ;;  %v354_v60 = vpop.permute.xlu1 %353 }
  0xd2   : > { %v359_v5 = vpop.permute.xlu0 %358  ;;  %v364_v26 = vpop.permute.xlu1 %363 }
 0x128   : > { %v504_v50 = vpop.f32.mrf.mxu0  ;;  %v524_v51 = vpop.f32.mrf.mxu1 }
 0x129   : > { %v505_v52 = vadd.f32 %v504_v50, %v329_v45  ;;  %v525_v53 = vadd.f32 %v524_v51, %v349_v49 }
 0x12a   : > { %v506_v54 = vpop.f32.mrf.mxu0  ;;  %v526_v55 = vpop.f32.mrf.mxu1 }
 0x12b   : > { %v507_v56 = vadd.f32 %v506_v54, %v329_v45  ;;  %v527_v57 = vadd.f32 %v526_v55, %v349_v49  ;;  %v543_v61 = vmax.f32 %v505_v52, 0.0  ;;  %v551_v62 = vmax.f32 %v525_v53, 0.0 }
 0x12c   : > { %v508_v58 = vpop.f32.mrf.mxu0  ;;  %v528_v59 = vpop.f32.mrf.mxu1 }
 0x12d   : > { %v544_v63 = vmax.f32 %v507_v56, 0.0  ;;  %v552_v0 = vmax.f32 %v527_v57, 0.0  ;;  %v509_v1 = vadd.f32 %v508_v58, %v334_v47  ;;  %v529_v2 = vadd.f32 %v528_v59, %v354_v60 }
 0x12e   : > { %v510_v3 = vpop.f32.mrf.mxu0  ;;  %v530_v4 = vpop.f32.mrf.mxu1 }
 0x12f   : > { %v812_v6 = vpack.c.bf16 %v544_v63, %v543_v61  ;;  %v816_v7 = vpack.c.bf16 %v552_v0, %v551_v62  ;;  %v511_v8 = vadd.f32 %v510_v3, %v334_v47  ;;  %v531_v9 = vadd.f32 %v530_v4, %v354_v60 }
 0x130   : > { %v514_v10 = vpop.f32.mrf.mxu0  ;;  %v534_v11 = vpop.f32.mrf.mxu1  ;;  %v545_v14 = vmax.f32 %v509_v1, 0.0  ;;  %v553_v15 = vmax.f32 %v529_v2, 0.0 }
 0x131   : > { %607 = vst [vmem:[%s1165_s12] sm:$0xff] %v812_v6  ;;  %611 = vst [vmem:[%s1165_s12 + $0x20] sm:$0xff] %v816_v7  ;;  %v515_v12 = vadd.f32 %v514_v10, %v339_v46  ;;  %v535_v13 = vadd.f32 %v534_v11, %v359_v5  ;;  %v546_v16 = vmax.f32 %v511_v8, 0.0  ;;  %v554_v17 = vmax.f32 %v531_v9, 0.0 }
 0x132   : > { %v516_v18 = vpop.f32.mrf.mxu0  ;;  %v536_v19 = vpop.f32.mrf.mxu1 }
 0x133   : > { %v517_v20 = vadd.f32 %v516_v18, %v339_v46  ;;  %v537_v21 = vadd.f32 %v536_v19, %v359_v5  ;;  %v813_v22 = vpack.c.bf16 %v546_v16, %v545_v14  ;;  %v817_v23 = vpack.c.bf16 %v554_v17, %v553_v15 }
 0x134   : > { %v518_v24 = vpop.f32.mrf.mxu0  ;;  %v538_v25 = vpop.f32.mrf.mxu1  ;;  %v547_v27 = vmax.f32 %v515_v12, 0.0  ;;  %v555_v28 = vmax.f32 %v535_v13, 0.0 }
 0x135   : > { %v548_v29 = vmax.f32 %v517_v20, 0.0  ;;  %v556_v30 = vmax.f32 %v537_v21, 0.0  ;;  %608 = vst [vmem:[%s1165_s12 + $0x8] sm:$0xff] %v813_v22  ;;  %612 = vst [vmem:[%s1165_s12 + $0x28] sm:$0xff] %v817_v23  ;;  %v519_v31 = vadd.f32 %v518_v24, %v344_v48  ;;  %v539_v32 = vadd.f32 %v538_v25, %v364_v26 }
 0x136   : > { %v520_v33 = vpop.f32.mrf.mxu0  ;;  %v540_v34 = vpop.f32.mrf.mxu1 }
 0x137   : > { %v814_v35 = vpack.c.bf16 %v548_v29, %v547_v27  ;;  %v818_v36 = vpack.c.bf16 %v556_v30, %v555_v28  ;;  %v521_v37 = vadd.f32 %v520_v33, %v344_v48  ;;  %v541_v38 = vadd.f32 %v540_v34, %v364_v26 }
 0x138   : > { %v549_v39 = vmax.f32 %v519_v31, 0.0  ;;  %v557_v40 = vmax.f32 %v539_v32, 0.0  ;;  %v667_v45 = vld [vmem:[%s1165_s12] sm:$0xff] (%p1212_p9) }
 0x139   : > { %609 = vst [vmem:[%s1165_s12 + $0x10] sm:$0xff] %v814_v35  ;;  %613 = vst [vmem:[%s1165_s12 + $0x30] sm:$0xff] %v818_v36  ;;  %v550_v41 = vmax.f32 %v521_v37, 0.0  ;;  %v558_v42 = vmax.f32 %v541_v38, 0.0  ;;  %621 = sbr.rel (!%p1212_p9) target bundleno = 327 (0x147), region = 82  ;;  %v675_v49 = vld [vmem:[%s1165_s12 + $0x20] sm:$0xff] (%p1212_p9) }
 0x13a   : > { %668 = vst [vmem:[%s624_s4] sm:$0xff] (%p1212_p9), %v667_v45  ;;  %676 = vst [vmem:[%s624_s4 + $0x40] sm:$0xff] (%p1212_p9), %v675_v49 }
 0x13b   : > { %v815_v43 = vpack.c.bf16 %v550_v41, %v549_v39  ;;  %v819_v44 = vpack.c.bf16 %v558_v42, %v557_v40 }
 0x13c   : > { %v669_v46 = vld [vmem:[%s1165_s12 + $0x8] sm:$0xff] (%p1212_p9) }
 0x13d   : > { %610 = vst [vmem:[%s1165_s12 + $0x18] sm:$0xff] %v815_v43  ;;  %614 = vst [vmem:[%s1165_s12 + $0x38] sm:$0xff] %v819_v44  ;;  %v677_v50 = vld [vmem:[%s1165_s12 + $0x28] sm:$0xff] (%p1212_p9) }
 0x13e   : > { %670 = vst [vmem:[%s624_s4 + $0x10] sm:$0xff] %v669_v46  ;;  %678 = vst [vmem:[%s624_s4 + $0x50] sm:$0xff] %v677_v50 }
 0x140   : > { %v671_v47 = vld [vmem:[%s1165_s12 + $0x10] sm:$0xff] }
 0x141   : > { %672 = vst [vmem:[%s624_s4 + $0x20] sm:$0xff] %v671_v47  ;;  %v679_v51 = vld [vmem:[%s1165_s12 + $0x30] sm:$0xff] }
 0x142   : > { %680 = vst [vmem:[%s624_s4 + $0x60] sm:$0xff] %v679_v51 }
 0x144   : > { %v673_v48 = vld [vmem:[%s1165_s12 + $0x18] sm:$0xff] }
 0x145   : > { %674 = vst [vmem:[%s624_s4 + $0x30] sm:$0xff] %v673_v48  ;;  %v681_v52 = vld [vmem:[%s1165_s12 + $0x38] sm:$0xff] }
 0x146   : > { %682 = vst [vmem:[%s624_s4 + $0x70] sm:$0xff] %v681_v52 }
 0x147 PF: > { %p12_p12 = scmp.ge.s32.totalorder %s1047_s16, 4   ;;  %s1213_s12 = smov %s995_s13 }
 0x148   : > { %s1214_s13 = smov %s1057_s19  ;;  %s1215_s14 = smov %s1047_s16 }
 0x149   :  { %14 = sbr.rel (!%p12_p12) target bundleno = 3 (0x3), region = 152 }
 0x14e   :  { %698 = vsyncpa [#allocation3], 1 }
 0x14f   :  { %700 = vsyncpa [#allocation3 + $0x1], 1 }
 0x150   :  { %701 = vsyncpa [#allocation6], 1 }

// kernel: forward.7
= control target key start
LH: loop header
LB: loop body
LE: loop exit
PB: predicated region body
PF: predicated region fallthrough
CT: control target
= control target key end

     0   :  { %s1435_s12 = smov 0   ;;  %s1437_s13 = smov 0   ;;  %s1803_s0 = inlined_call_operand.vmem [shape: bf16[12,144], index: 0, kind: input, shape index: {}]   ;;  %s1804_s1 = inlined_call_operand.vmem [shape: bf16[144,2048], index: 1, kind: input, shape index: {}]   ;;  %s1805_s2 = inlined_call_operand.vmem [shape: f32[12,1], index: 2, kind: input, shape index: {}]   ;;  %s1806_s3 = inlined_call_operand.vmem [shape: f32[12,2048], index: 3, kind: output, shape index: {}]  }
   0x1   :  { %s1439_s14 = smov 0  }
   0x2 LB: > { %s1186_s15 = sadd.s32 4294967295, %s1412_s14   ;;  %s1452_s16 = sadd.s32 1, %s1412_s14   ;;  %s1412_s14 = sphi %s1439_s14, %s1810_s14   ;;  %s1408_s13 = sphi %s1437_s13, %s1809_s13   ;;  %s1404_s12 = sphi %s1435_s12, %s1808_s12  }
   0x3   : > { %s38_s17 = ssub.s32 %s1412_s14, %s1452_s16  ;;  %s41_s18 = sadd.s32 1, %s1408_s13 }
   0x4   : > { %p39_p0 = scmp.eq.s32.totalorder %s38_s17, 0  ;;  %p48_p1 = scmp.ne.s32.totalorder %s1408_s13, %s1404_s12 }
   0x5   : > { %p49_p2 = scmp.eq.s32.totalorder %s1412_s14, 0  ;;  %p99_p3 = scmp.eq.s32.totalorder %s1186_s15, 1 }
   0x6   : > { %s1463_s19 = scalar_select %p39_p0, %s1408_s13, %s41_s18  }
   0x7   : > { %p50_p4 = por %p49_p2, %p48_p1  ;;  %p1465_p5 = por %p99_p3, %p48_p1 }
   0x8   : > { %p1189_p6 = scmp.ge.s32.totalorder %s1412_s14, 2 }
   0xa   : > { %127 = sbr.rel (%p1189_p6) target bundleno = 56 (0x38), region = 24 }
   0xf   : > { %130 = sbr.rel (!%p50_p4) target bundleno = 56 (0x38), region = 28  ;;  %s132_s21 = sand.u32 (%p50_p4), 1, %s1408_s13  }
  0x10   : > { %s1293_s22 = sshll.u32 (%p50_p4), %s1412_s14, 5  ;;  %s1295_s23 = smul.u32 (%p50_p4), 576, %s132_s21 }
  0x11   : > { %s1475_s26 = scalar_lea.vmem (%p50_p4), %s1804_s1, %s1293_s22 }
  0x12   : > { %v150_v0 = vld [vmem:[%s1475_s26] sm:$0xff] (%p50_p4)  ;;  %v152_v1 = vld [vmem:[%s1475_s26 + $0x8] sm:$0xff] (%p50_p4)  ;;  %v154_v2 = vld [vmem:[%s1475_s26 + $0x10] sm:$0xff] (%p50_p4)  ;;  %s1483_s27 = scalar_lea.vmem (%p50_p4), [#allocation2], %s1295_s23 }
  0x13   : > { %v156_v3 = vld [vmem:[%s1475_s26 + $0x18] sm:$0xff] (%p50_p4)  ;;  %v158_v4 = vld [vmem:[%s1475_s26 + $0x40] sm:$0xff] (%p50_p4)  ;;  %v160_v5 = vld [vmem:[%s1475_s26 + $0x48] sm:$0xff] (%p50_p4)  ;;  %151 = vst [vmem:[%s1483_s27] sm:$0xff] (%p50_p4), %v150_v0 }
  0x14   : > { %153 = vst [vmem:[%s1483_s27 + $0x8] sm:$0xff] %v152_v1  ;;  %155 = vst [vmem:[%s1483_s27 + $0x10] sm:$0xff] %v154_v2  ;;  %v162_v6 = vld [vmem:[%s1475_s26 + $0x50] sm:$0xff]  ;;  %v164_v7 = vld [vmem:[%s1475_s26 + $0x58] sm:$0xff] }
  0x15   : > { %157 = vst [vmem:[%s1483_s27 + $0x18] sm:$0xff] %v156_v3  ;;  %159 = vst [vmem:[%s1483_s27 + $0x20] sm:$0xff] %v158_v4  ;;  %v166_v8 = vld [vmem:[%s1475_s26 + $0x80] sm:$0xff]  ;;  %v168_v9 = vld [vmem:[%s1475_s26 + $0x88] sm:$0xff] }
  0x16   : > { %161 = vst [vmem:[%s1483_s27 + $0x28] sm:$0xff] %v160_v5  ;;  %163 = vst [vmem:[%s1483_s27 + $0x30] sm:$0xff] %v162_v6  ;;  %v170_v10 = vld [vmem:[%s1475_s26 + $0x90] sm:$0xff]  ;;  %v172_v11 = vld [vmem:[%s1475_s26 + $0x98] sm:$0xff] }
  0x17   : > { %165 = vst [vmem:[%s1483_s27 + $0x38] sm:$0xff] %v164_v7  ;;  %167 = vst [vmem:[%s1483_s27 + $0x40] sm:$0xff] %v166_v8  ;;  %v174_v12 = vld [vmem:[%s1475_s26 + $0xc0] sm:$0xff]  ;;  %v176_v13 = vld [vmem:[%s1475_s26 + $0xc8] sm:$0xff] }
  0x18   : > { %169 = vst [vmem:[%s1483_s27 + $0x48] sm:$0xff] %v168_v9  ;;  %171 = vst [vmem:[%s1483_s27 + $0x50] sm:$0xff] %v170_v10  ;;  %v178_v14 = vld [vmem:[%s1475_s26 + $0xd0] sm:$0xff]  ;;  %v180_v15 = vld [vmem:[%s1475_s26 + $0xd8] sm:$0xff] }
  0x19   : > { %173 = vst [vmem:[%s1483_s27 + $0x58] sm:$0xff] %v172_v11  ;;  %175 = vst [vmem:[%s1483_s27 + $0x60] sm:$0xff] %v174_v12  ;;  %v182_v16 = vld [vmem:[%s1475_s26 + $0x100] sm:$0xff]  ;;  %v184_v17 = vld [vmem:[%s1475_s26 + $0x108] sm:$0xff] }
  0x1a   : > { %177 = vst [vmem:[%s1483_s27 + $0x68] sm:$0xff] %v176_v13  ;;  %179 = vst [vmem:[%s1483_s27 + $0x70] sm:$0xff] %v178_v14  ;;  %v186_v18 = vld [vmem:[%s1475_s26 + $0x110] sm:$0xff]  ;;  %v188_v19 = vld [vmem:[%s1475_s26 + $0x118] sm:$0xff] }
  0x1b   : > { %181 = vst [vmem:[%s1483_s27 + $0x78] sm:$0xff] %v180_v15  ;;  %183 = vst [vmem:[%s1483_s27 + $0x80] sm:$0xff] %v182_v16  ;;  %v190_v20 = vld [vmem:[%s1475_s26 + $0x140] sm:$0xff]  ;;  %v192_v21 = vld [vmem:[%s1475_s26 + $0x148] sm:$0xff] }
  0x1c   : > { %185 = vst [vmem:[%s1483_s27 + $0x88] sm:$0xff] %v184_v17  ;;  %187 = vst [vmem:[%s1483_s27 + $0x90] sm:$0xff] %v186_v18  ;;  %v194_v22 = vld [vmem:[%s1475_s26 + $0x150] sm:$0xff]  ;;  %v196_v23 = vld [vmem:[%s1475_s26 + $0x158] sm:$0xff] }
  0x1d   : > { %189 = vst [vmem:[%s1483_s27 + $0x98] sm:$0xff] %v188_v19  ;;  %191 = vst [vmem:[%s1483_s27 + $0xa0] sm:$0xff] %v190_v20  ;;  %v198_v24 = vld [vmem:[%s1475_s26 + $0x180] sm:$0xff]  ;;  %v200_v25 = vld [vmem:[%s1475_s26 + $0x188] sm:$0xff] }
  0x1e   : > { %193 = vst [vmem:[%s1483_s27 + $0xa8] sm:$0xff] %v192_v21  ;;  %195 = vst [vmem:[%s1483_s27 + $0xb0] sm:$0xff] %v194_v22  ;;  %v202_v26 = vld [vmem:[%s1475_s26 + $0x190] sm:$0xff]  ;;  %v204_v27 = vld [vmem:[%s1475_s26 + $0x198] sm:$0xff] }
  0x1f   : > { %197 = vst [vmem:[%s1483_s27 + $0xb8] sm:$0xff] %v196_v23  ;;  %199 = vst [vmem:[%s1483_s27 + $0xc0] sm:$0xff] %v198_v24  ;;  %v206_v28 = vld [vmem:[%s1475_s26 + $0x1c0] sm:$0xff]  ;;  %v208_v29 = vld [vmem:[%s1475_s26 + $0x1c8] sm:$0xff] }
  0x20   : > { %201 = vst [vmem:[%s1483_s27 + $0xc8] sm:$0xff] %v200_v25  ;;  %203 = vst [vmem:[%s1483_s27 + $0xd0] sm:$0xff] %v202_v26  ;;  %v210_v30 = vld [vmem:[%s1475_s26 + $0x1d0] sm:$0xff]  ;;  %v212_v31 = vld [vmem:[%s1475_s26 + $0x1d8] sm:$0xff] }
  0x21   : > { %205 = vst [vmem:[%s1483_s27 + $0xd8] sm:$0xff] %v204_v27  ;;  %207 = vst [vmem:[%s1483_s27 + $0xe0] sm:$0xff] %v206_v28  ;;  %v214_v32 = vld [vmem:[%s1475_s26 + $0x200] sm:$0xff]  ;;  %v216_v33 = vld [vmem:[%s1475_s26 + $0x208] sm:$0xff] }
  0x22   : > { %209 = vst [vmem:[%s1483_s27 + $0xe8] sm:$0xff] %v208_v29  ;;  %211 = vst [vmem:[%s1483_s27 + $0xf0] sm:$0xff] %v210_v30  ;;  %v218_v34 = vld [vmem:[%s1475_s26 + $0x210] sm:$0xff]  ;;  %v220_v35 = vld [vmem:[%s1475_s26 + $0x218] sm:$0xff] }
  0x23   : > { %213 = vst [vmem:[%s1483_s27 + $0xf8] sm:$0xff] %v212_v31  ;;  %215 = vst [vmem:[%s1483_s27 + $0x100] sm:$0xff] %v214_v32  ;;  %v222_v36 = vld [vmem:[%s1475_s26 + $0x240] sm:$0xff]  ;;  %v224_v37 = vld [vmem:[%s1475_s26 + $0x248] sm:$0xff] }
  0x24   : > { %217 = vst [vmem:[%s1483_s27 + $0x108] sm:$0xff] %v216_v33  ;;  %219 = vst [vmem:[%s1483_s27 + $0x110] sm:$0xff] %v218_v34  ;;  %v226_v38 = vld [vmem:[%s1475_s26 + $0x250] sm:$0xff]  ;;  %v228_v39 = vld [vmem:[%s1475_s26 + $0x258] sm:$0xff] }
  0x25   : > { %221 = vst [vmem:[%s1483_s27 + $0x118] sm:$0xff] %v220_v35  ;;  %223 = vst [vmem:[%s1483_s27 + $0x120] sm:$0xff] %v222_v36  ;;  %v230_v40 = vld [vmem:[%s1475_s26 + $0x280] sm:$0xff]  ;;  %v232_v41 = vld [vmem:[%s1475_s26 + $0x288] sm:$0xff] }
  0x26   : > { %225 = vst [vmem:[%s1483_s27 + $0x128] sm:$0xff] %v224_v37  ;;  %227 = vst [vmem:[%s1483_s27 + $0x130] sm:$0xff] %v226_v38  ;;  %v234_v42 = vld [vmem:[%s1475_s26 + $0x290] sm:$0xff]  ;;  %v236_v43 = vld [vmem:[%s1475_s26 + $0x298] sm:$0xff] }
  0x27   : > { %229 = vst [vmem:[%s1483_s27 + $0x138] sm:$0xff] %v228_v39  ;;  %231 = vst [vmem:[%s1483_s27 + $0x140] sm:$0xff] %v230_v40  ;;  %v238_v44 = vld [vmem:[%s1475_s26 + $0x2c0] sm:$0xff]  ;;  %v240_v45 = vld [vmem:[%s1475_s26 + $0x2c8] sm:$0xff] }
  0x28   : > { %233 = vst [vmem:[%s1483_s27 + $0x148] sm:$0xff] %v232_v41  ;;  %235 = vst [vmem:[%s1483_s27 + $0x150] sm:$0xff] %v234_v42  ;;  %v242_v46 = vld [vmem:[%s1475_s26 + $0x2d0] sm:$0xff]  ;;  %v244_v47 = vld [vmem:[%s1475_s26 + $0x2d8] sm:$0xff] }
  0x29   : > { %237 = vst [vmem:[%s1483_s27 + $0x158] sm:$0xff] %v236_v43  ;;  %239 = vst [vmem:[%s1483_s27 + $0x160] sm:$0xff] %v238_v44  ;;  %v246_v48 = vld [vmem:[%s1475_s26 + $0x300] sm:$0xff]  ;;  %v248_v49 = vld [vmem:[%s1475_s26 + $0x308] sm:$0xff] }
  0x2a   : > { %241 = vst [vmem:[%s1483_s27 + $0x168] sm:$0xff] %v240_v45  ;;  %243 = vst [vmem:[%s1483_s27 + $0x170] sm:$0xff] %v242_v46  ;;  %v250_v50 = vld [vmem:[%s1475_s26 + $0x310] sm:$0xff]  ;;  %v252_v51 = vld [vmem:[%s1475_s26 + $0x318] sm:$0xff] }
  0x2b   : > { %245 = vst [vmem:[%s1483_s27 + $0x178] sm:$0xff] %v244_v47  ;;  %247 = vst [vmem:[%s1483_s27 + $0x180] sm:$0xff] %v246_v48  ;;  %v254_v52 = vld [vmem:[%s1475_s26 + $0x340] sm:$0xff]  ;;  %v256_v53 = vld [vmem:[%s1475_s26 + $0x348] sm:$0xff] }
  0x2c   : > { %249 = vst [vmem:[%s1483_s27 + $0x188] sm:$0xff] %v248_v49  ;;  %251 = vst [vmem:[%s1483_s27 + $0x190] sm:$0xff] %v250_v50  ;;  %v258_v54 = vld [vmem:[%s1475_s26 + $0x350] sm:$0xff]  ;;  %v260_v55 = vld [vmem:[%s1475_s26 + $0x358] sm:$0xff] }
  0x2d   : > { %253 = vst [vmem:[%s1483_s27 + $0x198] sm:$0xff] %v252_v51  ;;  %255 = vst [vmem:[%s1483_s27 + $0x1a0] sm:$0xff] %v254_v52  ;;  %v262_v56 = vld [vmem:[%s1475_s26 + $0x380] sm:$0xff]  ;;  %v264_v57 = vld [vmem:[%s1475_s26 + $0x388] sm:$0xff] }
  0x2e   : > { %257 = vst [vmem:[%s1483_s27 + $0x1a8] sm:$0xff] %v256_v53  ;;  %259 = vst [vmem:[%s1483_s27 + $0x1b0] sm:$0xff] %v258_v54  ;;  %v266_v58 = vld [vmem:[%s1475_s26 + $0x390] sm:$0xff]  ;;  %v268_v59 = vld [vmem:[%s1475_s26 + $0x398] sm:$0xff] }
  0x2f   : > { %261 = vst [vmem:[%s1483_s27 + $0x1b8] sm:$0xff] %v260_v55  ;;  %263 = vst [vmem:[%s1483_s27 + $0x1c0] sm:$0xff] %v262_v56  ;;  %v270_v60 = vld [vmem:[%s1475_s26 + $0x3c0] sm:$0xff]  ;;  %v272_v61 = vld [vmem:[%s1475_s26 + $0x3c8] sm:$0xff] }
  0x30   : > { %265 = vst [vmem:[%s1483_s27 + $0x1c8] sm:$0xff] %v264_v57  ;;  %267 = vst [vmem:[%s1483_s27 + $0x1d0] sm:$0xff] %v266_v58  ;;  %v274_v62 = vld [vmem:[%s1475_s26 + $0x3d0] sm:$0xff]  ;;  %v276_v63 = vld [vmem:[%s1475_s26 + $0x3d8] sm:$0xff] }
  0x31   : > { %269 = vst [vmem:[%s1483_s27 + $0x1d8] sm:$0xff] %v268_v59  ;;  %271 = vst [vmem:[%s1483_s27 + $0x1e0] sm:$0xff] %v270_v60  ;;  %v278_v0 = vld [vmem:[%s1475_s26 + $0x400] sm:$0xff]  ;;  %v280_v1 = vld [vmem:[%s1475_s26 + $0x408] sm:$0xff] }
  0x32   : > { %273 = vst [vmem:[%s1483_s27 + $0x1e8] sm:$0xff] %v272_v61  ;;  %275 = vst [vmem:[%s1483_s27 + $0x1f0] sm:$0xff] %v274_v62  ;;  %v282_v2 = vld [vmem:[%s1475_s26 + $0x410] sm:$0xff]  ;;  %v284_v3 = vld [vmem:[%s1475_s26 + $0x418] sm:$0xff] }
  0x33   : > { %277 = vst [vmem:[%s1483_s27 + $0x1f8] sm:$0xff] %v276_v63  ;;  %279 = vst [vmem:[%s1483_s27 + $0x200] sm:$0xff] %v278_v0  ;;  %v286_v4 = vld [vmem:[%s1475_s26 + $0x440] sm:$0xff]  ;;  %v288_v5 = vld [vmem:[%s1475_s26 + $0x448] sm:$0xff] }
  0x34   : > { %281 = vst [vmem:[%s1483_s27 + $0x208] sm:$0xff] %v280_v1  ;;  %283 = vst [vmem:[%s1483_s27 + $0x210] sm:$0xff] %v282_v2  ;;  %v290_v6 = vld [vmem:[%s1475_s26 + $0x450] sm:$0xff]  ;;  %v292_v7 = vld [vmem:[%s1475_s26 + $0x458] sm:$0xff] }
  0x35   : > { %285 = vst [vmem:[%s1483_s27 + $0x218] sm:$0xff] %v284_v3  ;;  %287 = vst [vmem:[%s1483_s27 + $0x220] sm:$0xff] %v286_v4 }
  0x36   : > { %289 = vst [vmem:[%s1483_s27 + $0x228] sm:$0xff] %v288_v5  ;;  %291 = vst [vmem:[%s1483_s27 + $0x230] sm:$0xff] %v290_v6 }
  0x37   : > { %293 = vst [vmem:[%s1483_s27 + $0x238] sm:$0xff] %v292_v7 }
  0x38 PF: > { %p1192_p7 = scmp.ge.s32.totalorder %s1412_s14, 1  ;;  %p298_p8 = scmp.lt.s32.totalorder %s1412_s14, 3 }
  0x3a   : > { %p299_p9 = pnand %p1192_p7, %p298_p8 }
  0x3b   : > { %s305_s28 = sand.u32 (!%p299_p9), 1, %s1404_s12  }
  0x3c   : > { %302 = sbr.rel (%p299_p9) target bundleno = 386 (0x182), region = 51  ;;  %s1193_s17 = sshll.u32 (!%p299_p9), %s305_s28, 7 }
  0x3d   : > { %s1296_s29 = smul.u32 (!%p299_p9), 576, %s305_s28  ;;  %s1744_s18 = scalar_lea.vmem (!%p299_p9), [#allocation3], %s1193_s17 }
  0x3f   : > { %s1643_s9 = scalar_lea.vmem (!%p299_p9), [#allocation2], %s1296_s29 }
  0x41   : > { %vm785_vm0 = vcmask 130048   ;;  %v1631_v8 = vld [vmem:[%s1803_s0 + $0x4] ss:$8 sps:$4 sm:$0x3f]   ;;  %v1414_v9 = vmov 0   ;;  %s1294_s12 = sshll.u32 (%p1465_p5), %s1186_s15, 6 }
  0x42   : > { %1322 = vset.pattern.permute.xlu0 %v1414_v9  ;;  %v404_v10 = vld [vmem:[%s1805_s2] sm:$0xff]  ;;  %1268 = vmatprep.mubr.msk.bf16.mxu0 %vm785_vm0, %v1631_v8  ;;  %v405_v11 = vld [vmem:[%s1805_s2 + $0x8] sm:$0xf]  ;;  %s1082_s20 = scalar_lea.vmem (%p1465_p5), %s1806_s3, %s1294_s12 }
  0x43   : > { %408 = vperm.xlu0 %1322, %v404_v10   ;;  %1269 = vmatprep.mubr.msk.bf16.mxu1 %vm785_vm0, %v1631_v8  ;;  %v388_v12 = vld [vmem:[%s1643_s9 + $0x1c0] sm:$0xff]  ;;  %v389_v14 = vld [vmem:[%s1643_s9 + $0x1c8] sm:$0xff] }
  0x44   : > { %v392_v13 = vld [vmem:[%s1643_s9 + $0x1e0] sm:$0xff]  ;;  %v393_v16 = vld [vmem:[%s1643_s9 + $0x1e8] sm:$0xff] }
  0x45   : > { %v1253_v15 = vcombine.high %v388_v12, %v392_v13  ;;  %v1252_v17 = vcombine.low %v388_v12, %v392_v13  ;;  %v380_v18 = vld [vmem:[%s1643_s9 + $0x180] sm:$0xff]  ;;  %v1255_v20 = vcombine.high %v389_v14, %v393_v16  ;;  %v1254_v21 = vcombine.low %v389_v14, %v393_v16  ;;  %v381_v23 = vld [vmem:[%s1643_s9 + $0x188] sm:$0xff] }
  0x46   : > { %v384_v19 = vld [vmem:[%s1643_s9 + $0x1a0] sm:$0xff]  ;;  %v385_v24 = vld [vmem:[%s1643_s9 + $0x1a8] sm:$0xff] }
  0x47   : > { %v1245_v22 = vcombine.high %v380_v18, %v384_v19  ;;  %v372_v25 = vld [vmem:[%s1643_s9 + $0x140] sm:$0xff]  ;;  %413 = vperm.xlu0 %1322, %v405_v11   ;;  %789 = vmatprep.subr.bf16.mxu0 %v1253_v15  ;;  %v1247_v26 = vcombine.high %v381_v23, %v385_v24  ;;  %v373_v28 = vld [vmem:[%s1643_s9 + $0x148] sm:$0xff]  ;;  %v1244_v30 = vcombine.low %v380_v18, %v384_v19  ;;  %v390_v19 = vld [vmem:[%s1643_s9 + $0x1d0] sm:$0xff] }
  0x48   : > { %v376_v27 = vld [vmem:[%s1643_s9 + $0x160] sm:$0xff]  ;;  %v377_v29 = vld [vmem:[%s1643_s9 + $0x168] sm:$0xff]  ;;  %832 = vmatprep.subr.bf16.mxu1 %v1255_v20  ;;  %790 = vmatpush1.bf16.msra.mxu0 %v1252_v17  ;;  %v1246_v31 = vcombine.low %v381_v23, %v385_v24  ;;  %v394_v20 = vld [vmem:[%s1643_s9 + $0x1f0] sm:$0xff] }
  0x49   : > { %833 = vmatpush1.bf16.msra.mxu1 %v1254_v21  ;;  %791 = vmatprep.subr.bf16.mxu0 %v1245_v22  ;;  %v1237_v32 = vcombine.high %v372_v25, %v376_v27  ;;  %v1239_v33 = vcombine.high %v373_v28, %v377_v29  ;;  %v364_v34 = vld [vmem:[%s1643_s9 + $0x100] sm:$0xff]  ;;  %v365_v36 = vld [vmem:[%s1643_s9 + $0x108] sm:$0xff]  ;;  %v1236_v38 = vcombine.low %v372_v25, %v376_v27  ;;  %v391_v21 = vld [vmem:[%s1643_s9 + $0x1d8] sm:$0xff] }
  0x4a   : > { %834 = vmatprep.subr.bf16.mxu1 %v1247_v26  ;;  %v368_v35 = vld [vmem:[%s1643_s9 + $0x120] sm:$0xff]  ;;  %v369_v37 = vld [vmem:[%s1643_s9 + $0x128] sm:$0xff]  ;;  %v1238_v39 = vcombine.low %v373_v28, %v377_v29  ;;  %v395_v22 = vld [vmem:[%s1643_s9 + $0x1f8] sm:$0xff]  ;;  %v1257_v25 = vcombine.high %v390_v19, %v394_v20 }
  0x4b   : > { %v1229_v40 = vcombine.high %v364_v34, %v368_v35  ;;  %v1231_v41 = vcombine.high %v365_v36, %v369_v37  ;;  %v356_v42 = vld [vmem:[%s1643_s9 + $0xc0] sm:$0xff]  ;;  %v357_v44 = vld [vmem:[%s1643_s9 + $0xc8] sm:$0xff]  ;;  %v1228_v46 = vcombine.low %v364_v34, %v368_v35  ;;  %v1230_v47 = vcombine.low %v365_v36, %v369_v37  ;;  %v382_v27 = vld [vmem:[%s1643_s9 + $0x190] sm:$0xff] }
  0x4c   : > { %792 = vmatpush1.bf16.msra.mxu0 %v1244_v30  ;;  %v360_v43 = vld [vmem:[%s1643_s9 + $0xe0] sm:$0xff]  ;;  %v361_v45 = vld [vmem:[%s1643_s9 + $0xe8] sm:$0xff]  ;;  %v1259_v26 = vcombine.high %v391_v21, %v395_v22  ;;  %v386_v28 = vld [vmem:[%s1643_s9 + $0x1b0] sm:$0xff] }
  0x4d   : > { %835 = vmatpush1.bf16.msra.mxu1 %v1246_v31  ;;  %793 = vmatprep.subr.bf16.mxu0 %v1237_v32  ;;  %v1221_v48 = vcombine.high %v356_v42, %v360_v43  ;;  %v1223_v49 = vcombine.high %v357_v44, %v361_v45  ;;  %v348_v50 = vld [vmem:[%s1643_s9 + $0x80] sm:$0xff]  ;;  %v349_v52 = vld [vmem:[%s1643_s9 + $0x88] sm:$0xff]  ;;  %v1220_v54 = vcombine.low %v356_v42, %v360_v43  ;;  %v383_v30 = vld [vmem:[%s1643_s9 + $0x198] sm:$0xff] }
  0x4e   : > { %836 = vmatprep.subr.bf16.mxu1 %v1239_v33  ;;  %v352_v51 = vld [vmem:[%s1643_s9 + $0xa0] sm:$0xff]  ;;  %v353_v53 = vld [vmem:[%s1643_s9 + $0xa8] sm:$0xff]  ;;  %v1222_v55 = vcombine.low %v357_v44, %v361_v45  ;;  %v387_v31 = vld [vmem:[%s1643_s9 + $0x1b8] sm:$0xff]  ;;  %v1256_v32 = vcombine.low %v390_v19, %v394_v20  ;;  %v1258_v33 = vcombine.low %v391_v21, %v395_v22  ;;  %v1249_v34 = vcombine.high %v382_v27, %v386_v28 }
  0x4f   : > { %v1213_v56 = vcombine.high %v348_v50, %v352_v51  ;;  %v1215_v57 = vcombine.high %v349_v52, %v353_v53  ;;  %v340_v58 = vld [vmem:[%s1643_s9 + $0x40] sm:$0xff]  ;;  %v341_v60 = vld [vmem:[%s1643_s9 + $0x48] sm:$0xff]  ;;  %v1212_v62 = vcombine.low %v348_v50, %v352_v51  ;;  %v1214_v63 = vcombine.low %v349_v52, %v353_v53  ;;  %v374_v36 = vld [vmem:[%s1643_s9 + $0x150] sm:$0xff] }
  0x50   : > { %794 = vmatpush1.bf16.msra.mxu0 %v1236_v38  ;;  %v344_v59 = vld [vmem:[%s1643_s9 + $0x60] sm:$0xff]  ;;  %v345_v61 = vld [vmem:[%s1643_s9 + $0x68] sm:$0xff]  ;;  %v1251_v35 = vcombine.high %v383_v30, %v387_v31  ;;  %v378_v37 = vld [vmem:[%s1643_s9 + $0x170] sm:$0xff] }
  0x51   : > { %837 = vmatpush1.bf16.msra.mxu1 %v1238_v39  ;;  %795 = vmatprep.subr.bf16.mxu0 %v1229_v40  ;;  %v1205_v0 = vcombine.high %v340_v58, %v344_v59  ;;  %v1207_v1 = vcombine.high %v341_v60, %v345_v61  ;;  %v332_v2 = vld [vmem:[%s1643_s9] sm:$0xff]  ;;  %v333_v4 = vld [vmem:[%s1643_s9 + $0x8] sm:$0xff]  ;;  %v1204_v6 = vcombine.low %v340_v58, %v344_v59  ;;  %v375_v38 = vld [vmem:[%s1643_s9 + $0x158] sm:$0xff] }
  0x52   : > { %838 = vmatprep.subr.bf16.mxu1 %v1231_v41  ;;  %v336_v3 = vld [vmem:[%s1643_s9 + $0x20] sm:$0xff]  ;;  %v337_v5 = vld [vmem:[%s1643_s9 + $0x28] sm:$0xff]  ;;  %v1206_v7 = vcombine.low %v341_v60, %v345_v61  ;;  %v379_v39 = vld [vmem:[%s1643_s9 + $0x178] sm:$0xff]  ;;  %v1248_v40 = vcombine.low %v382_v27, %v386_v28  ;;  %v1250_v41 = vcombine.low %v383_v30, %v387_v31  ;;  %v1241_v42 = vcombine.high %v374_v36, %v378_v37 }
  0x53   : > { %v1197_v9 = vcombine.high %v332_v2, %v336_v3  ;;  %v1199_v10 = vcombine.high %v333_v4, %v337_v5  ;;  %v396_v11 = vld [vmem:[%s1643_s9 + $0x200] sm:$0xff]  ;;  %v397_v13 = vld [vmem:[%s1643_s9 + $0x208] sm:$0xff]  ;;  %v1196_v15 = vcombine.low %v332_v2, %v336_v3  ;;  %v1198_v16 = vcombine.low %v333_v4, %v337_v5  ;;  %v366_v44 = vld [vmem:[%s1643_s9 + $0x110] sm:$0xff] }
  0x54   : > { %796 = vmatpush1.bf16.msra.mxu0 %v1228_v46  ;;  %v400_v12 = vld [vmem:[%s1643_s9 + $0x220] sm:$0xff]  ;;  %v401_v14 = vld [vmem:[%s1643_s9 + $0x228] sm:$0xff]  ;;  %v1243_v43 = vcombine.high %v375_v38, %v379_v39  ;;  %v370_v45 = vld [vmem:[%s1643_s9 + $0x130] sm:$0xff] }
  0x55   : > { %839 = vmatpush1.bf16.msra.mxu1 %v1230_v47  ;;  %797 = vmatprep.subr.bf16.mxu0 %v1221_v48  ;;  %v1261_v17 = vcombine.high %v396_v11, %v400_v12  ;;  %v1263_v18 = vcombine.high %v397_v13, %v401_v14  ;;  %v1260_v23 = vcombine.low %v396_v11, %v400_v12  ;;  %v1690_v29 = vld [vmem:[%s1803_s0] ss:$8 sps:$4 sm:$0x3f]   ;;  %v367_v46 = vld [vmem:[%s1643_s9 + $0x118] sm:$0xff]  ;;  %v358_v52 = vld [vmem:[%s1643_s9 + $0xd0] sm:$0xff] }
  0x56   : > { %840 = vmatprep.subr.bf16.mxu1 %v1223_v49  ;;  %v1262_v24 = vcombine.low %v397_v13, %v401_v14  ;;  %v371_v47 = vld [vmem:[%s1643_s9 + $0x138] sm:$0xff]  ;;  %v1240_v48 = vcombine.low %v374_v36, %v378_v37  ;;  %v1242_v49 = vcombine.low %v375_v38, %v379_v39  ;;  %v1233_v50 = vcombine.high %v366_v44, %v370_v45  ;;  %v362_v53 = vld [vmem:[%s1643_s9 + $0xf0] sm:$0xff] }
  0x57   : > { %v1235_v51 = vcombine.high %v367_v46, %v371_v47  ;;  %v350_v59 = vld [vmem:[%s1643_s9 + $0x90] sm:$0xff]  ;;  %v351_v61 = vld [vmem:[%s1643_s9 + $0x98] sm:$0xff] }
  0x58   : > { %798 = vmatpush1.bf16.msra.mxu0 %v1220_v54  ;;  %v359_v54 = vld [vmem:[%s1643_s9 + $0xd8] sm:$0xff]  ;;  %v354_v60 = vld [vmem:[%s1643_s9 + $0xb0] sm:$0xff] }
  0x59   : > { %841 = vmatpush1.bf16.msra.mxu1 %v1222_v55  ;;  %799 = vmatprep.subr.bf16.mxu0 %v1213_v56  ;;  %v363_v55 = vld [vmem:[%s1643_s9 + $0xf8] sm:$0xff]  ;;  %v1232_v56 = vcombine.low %v366_v44, %v370_v45  ;;  %v342_v3 = vld [vmem:[%s1643_s9 + $0x50] sm:$0xff] }
  0x5a   : > { %842 = vmatprep.subr.bf16.mxu1 %v1215_v57  ;;  %v1225_v57 = vcombine.high %v358_v52, %v362_v53  ;;  %v1227_v58 = vcombine.high %v359_v54, %v363_v55  ;;  %v346_v4 = vld [vmem:[%s1643_s9 + $0x70] sm:$0xff]  ;;  %v343_v5 = vld [vmem:[%s1643_s9 + $0x58] sm:$0xff] }
  0x5b   : > { %v334_v12 = vld [vmem:[%s1643_s9 + $0x10] sm:$0xff]  ;;  %v335_v14 = vld [vmem:[%s1643_s9 + $0x18] sm:$0xff] }
  0x5c   : > { %800 = vmatpush1.bf16.msra.mxu0 %v1212_v62  ;;  %v355_v62 = vld [vmem:[%s1643_s9 + $0xb8] sm:$0xff]  ;;  %v338_v13 = vld [vmem:[%s1643_s9 + $0x30] sm:$0xff] }
  0x5d   : > { %843 = vmatpush1.bf16.msra.mxu1 %v1214_v63  ;;  %801 = vmatprep.subr.bf16.mxu0 %v1205_v0  ;;  %v1224_v63 = vcombine.low %v358_v52, %v362_v53  ;;  %v1226_v0 = vcombine.low %v359_v54, %v363_v55  ;;  %v1219_v2 = vcombine.high %v351_v61, %v355_v62  ;;  %v398_v20 = vld [vmem:[%s1643_s9 + $0x210] sm:$0xff]  ;;  %v399_v22 = vld [vmem:[%s1643_s9 + $0x218] sm:$0xff] }
  0x5e   : > { %844 = vmatprep.subr.bf16.mxu1 %v1207_v1  ;;  %v1217_v1 = vcombine.high %v350_v59, %v354_v60  ;;  %v402_v21 = vld [vmem:[%s1643_s9 + $0x230] sm:$0xff] }
  0x5f   : > { %v1264_v28 = vcombine.low %v398_v20, %v402_v21 }
  0x60   : > { %802 = vmatpush1.bf16.msra.mxu0 %v1204_v6  ;;  %v347_v6 = vld [vmem:[%s1643_s9 + $0x78] sm:$0xff] }
  0x61   : > { %845 = vmatpush1.bf16.msra.mxu1 %v1206_v7  ;;  %803 = vmatprep.subr.bf16.mxu0 %v1197_v9  ;;  %v1216_v7 = vcombine.low %v350_v59, %v354_v60  ;;  %v1218_v9 = vcombine.low %v351_v61, %v355_v62  ;;  %v1211_v11 = vcombine.high %v343_v5, %v347_v6 }
  0x62   : > { %846 = vmatprep.subr.bf16.mxu1 %v1199_v10  ;;  %v1209_v10 = vcombine.high %v342_v3, %v346_v4 }
  0x64   : > { %804 = vmatpush1.bf16.msra.mxu0 %v1196_v15  ;;  %v339_v15 = vld [vmem:[%s1643_s9 + $0x38] sm:$0xff] }
  0x65   : > { %847 = vmatpush1.bf16.msra.mxu1 %v1198_v16  ;;  %819 = vmatprep.subr.bf16.mxu0 %v1261_v17  ;;  %v1208_v16 = vcombine.low %v342_v3, %v346_v4  ;;  %v1210_v17 = vcombine.low %v343_v5, %v347_v6  ;;  %v1203_v19 = vcombine.high %v335_v14, %v339_v15 }
  0x66   : > { %862 = vmatprep.subr.bf16.mxu1 %v1263_v18  ;;  %v1201_v18 = vcombine.high %v334_v12, %v338_v13 }
  0x68   : > { %820 = vmatpush2.bf16.msra.mxu0 %v1260_v23  ;;  %v403_v23 = vld [vmem:[%s1643_s9 + $0x238] sm:$0xff] }
  0x69   : > { %863 = vmatpush2.bf16.msra.mxu1 %v1262_v24  ;;  %875 = vmatprep.subr.bf16.mxu0 %v1257_v25  ;;  %v1200_v24 = vcombine.low %v334_v12, %v338_v13  ;;  %v1202_v25 = vcombine.low %v335_v14, %v339_v15  ;;  %v1267_v27 = vcombine.high %v399_v22, %v403_v23 }
  0x6a   : > { %918 = vmatprep.subr.bf16.mxu1 %v1259_v26  ;;  %v1265_v26 = vcombine.high %v398_v20, %v402_v21  ;;  %v1266_v30 = vcombine.low %v399_v22, %v403_v23 }
  0x6b   : > { %822 = vmatmul.mubr.bf16.vlgmr.msra.gmra.mxu0 %v1690_v29 }
  0x6c   : > { %865 = vmatmul.mubr.bf16.vlgmr.msra.gmra.mxu1 %v1690_v29  ;;  %876 = vmatpush1.bf16.msra.mxu0 %v1256_v32 }
  0x6d   : > { %919 = vmatpush1.bf16.msra.mxu1 %v1258_v33  ;;  %877 = vmatprep.subr.bf16.mxu0 %v1249_v34 }
  0x6e   : > { %920 = vmatprep.subr.bf16.mxu1 %v1251_v35  ;;  %1270 = vmatprep.mubr.msk.bf16.mxu0 %vm785_vm0, %v1631_v8 }
  0x6f   : > { %1271 = vmatprep.mubr.msk.bf16.mxu1 %vm785_vm0, %v1631_v8  ;;  %v1234_v8 = vcombine.low %v367_v46, %v371_v47 }
  0x70   : > { %878 = vmatpush1.bf16.msra.mxu0 %v1248_v40 }
  0x71   : > { %921 = vmatpush1.bf16.msra.mxu1 %v1250_v41  ;;  %879 = vmatprep.subr.bf16.mxu0 %v1241_v42 }
  0x72   : > { %922 = vmatprep.subr.bf16.mxu1 %v1243_v43 }
  0x74   : > { %880 = vmatpush1.bf16.msra.mxu0 %v1240_v48 }
  0x75   : > { %923 = vmatpush1.bf16.msra.mxu1 %v1242_v49  ;;  %881 = vmatprep.subr.bf16.mxu0 %v1233_v50 }
  0x76   : > { %924 = vmatprep.subr.bf16.mxu1 %v1235_v51 }
  0x78   : > { %882 = vmatpush1.bf16.msra.mxu0 %v1232_v56 }
  0x79   : > { %925 = vmatpush1.bf16.msra.mxu1 %v1234_v8  ;;  %883 = vmatprep.subr.bf16.mxu0 %v1225_v57 }
  0x7a   : > { %926 = vmatprep.subr.bf16.mxu1 %v1227_v58 }
  0x7c   : > { %884 = vmatpush1.bf16.msra.mxu0 %v1224_v63 }
  0x7d   : > { %927 = vmatpush1.bf16.msra.mxu1 %v1226_v0  ;;  %885 = vmatprep.subr.bf16.mxu0 %v1217_v1 }
  0x7e   : > { %928 = vmatprep.subr.bf16.mxu1 %v1219_v2 }
  0x80   : > { %886 = vmatpush1.bf16.msra.mxu0 %v1216_v7 }
  0x81   : > { %929 = vmatpush1.bf16.msra.mxu1 %v1218_v9  ;;  %887 = vmatprep.subr.bf16.mxu0 %v1209_v10 }
  0x82   : > { %930 = vmatprep.subr.bf16.mxu1 %v1211_v11 }
  0x84   : > { %888 = vmatpush1.bf16.msra.mxu0 %v1208_v16 }
  0x85   : > { %931 = vmatpush1.bf16.msra.mxu1 %v1210_v17  ;;  %889 = vmatprep.subr.bf16.mxu0 %v1201_v18 }
  0x86   : > { %932 = vmatprep.subr.bf16.mxu1 %v1203_v19 }
  0x88   : > { %890 = vmatpush1.bf16.msra.mxu0 %v1200_v24 }
  0x89   : > { %933 = vmatpush1.bf16.msra.mxu1 %v1202_v25  ;;  %905 = vmatprep.subr.bf16.mxu0 %v1265_v26 }
  0x8a   : > { %948 = vmatprep.subr.bf16.mxu1 %v1267_v27 }
  0x8c   : > { %906 = vmatpush2.bf16.msra.mxu0 %v1264_v28 }
  0x8d   : > { %949 = vmatpush2.bf16.msra.mxu1 %v1266_v30 }
  0x8f   : > { %908 = vmatmul.mubr.bf16.vlgmr.msra.gmra.mxu0 %v1690_v29 }
  0x90   : > { %951 = vmatmul.mubr.bf16.vlgmr.msra.gmra.mxu1 %v1690_v29 }
  0xbe   : > { %v1730_v31 = vpop.permute.xlu0 %408 }
  0xc2   : > { %v1734_v37 = vpop.permute.xlu0 %413 }
 0x12b   : > { %v823_v32 = vpop.f32.mrf.mxu0 }
 0x12c   : > { %v824_v33 = vadd.f32 %v823_v32, %v1730_v31  ;;  %v866_v34 = vpop.f32.mrf.mxu1 }
 0x12d   : > { %v867_v35 = vadd.f32 %v866_v34, %v1730_v31  ;;  %v825_v36 = vpop.f32.mrf.mxu0 }
 0x12e   : > { %v1272_v38 = vmul.f32 -1.442695, %v824_v33  ;;  %v826_v39 = vadd.f32 %v825_v36, %v1730_v31  ;;  %v868_v40 = vpop.f32.mrf.mxu1 }
 0x12f   : > { %v1274_v41 = vmul.f32 -1.442695, %v867_v35  ;;  %v869_v42 = vadd.f32 %v868_v40, %v1730_v31  ;;  %v827_v43 = vpop.f32.mrf.mxu0 }
 0x130   : > { %1326 = vpow2.f32 %v1272_v38  ;;  %v1273_v29 = vmul.f32 -1.442695, %v826_v39  ;;  %v828_v44 = vadd.f32 %v827_v43, %v1734_v37  ;;  %v870_v45 = vpop.f32.mrf.mxu1 }
 0x131   : > { %1328 = vpow2.f32 %v1274_v41  ;;  %v1275_v46 = vmul.f32 -1.442695, %v869_v42  ;;  %v871_v47 = vadd.f32 %v870_v45, %v1734_v37  ;;  %v829_v48 = vpop.f32.mrf.mxu0 }
 0x132   : > { %1330 = vpow2.f32 %v1273_v29  ;;  %v1280_v49 = vmul.f32 -1.442695, %v828_v44  ;;  %v830_v50 = vadd.f32 %v829_v48, %v1734_v37  ;;  %v872_v51 = vpop.f32.mrf.mxu1 }
 0x133   : > { %1332 = vpow2.f32 %v1275_v46  ;;  %v1282_v52 = vmul.f32 -1.442695, %v871_v47  ;;  %v873_v53 = vadd.f32 %v872_v51, %v1734_v37 }
 0x134   : > { %1334 = vpow2.f32 %v1280_v49  ;;  %v1281_v54 = vmul.f32 -1.442695, %v830_v50 }
 0x135   : > { %1336 = vpow2.f32 %v1282_v52  ;;  %v1283_v55 = vmul.f32 -1.442695, %v873_v53 }
 0x136   : > { %1338 = vpow2.f32 %v1281_v54 }
 0x137   : > { %1340 = vpow2.f32 %v1283_v55 }
 0x13d   : > { %v1327_v56 = vpop.eup %1326 }
 0x13e   : > { %v1329_v8 = vpop.eup %1328  ;;  %v1009_v57 = vadd.f32 1.0, %v1327_v56 }
 0x13f   : > { %v1331_v58 = vpop.eup %1330  ;;  %v1011_v59 = vadd.f32 1.0, %v1329_v8 }
 0x140   : > { %v1333_v60 = vpop.eup %1332  ;;  %1342 = vrcp.f32 %v1009_v57  ;;  %v1010_v61 = vadd.f32 1.0, %v1331_v58 }
 0x141   : > { %v1335_v62 = vpop.eup %1334  ;;  %1344 = vrcp.f32 %v1011_v59  ;;  %v1012_v63 = vadd.f32 1.0, %v1333_v60 }
 0x142   : > { %v1337_v0 = vpop.eup %1336  ;;  %1346 = vrcp.f32 %v1010_v61  ;;  %v1017_v1 = vadd.f32 1.0, %v1335_v62 }
 0x143   : > { %v1339_v2 = vpop.eup %1338  ;;  %1348 = vrcp.f32 %v1012_v63  ;;  %v1019_v3 = vadd.f32 1.0, %v1337_v0 }
 0x144   : > { %v1341_v4 = vpop.eup %1340  ;;  %1350 = vrcp.f32 %v1017_v1  ;;  %v1018_v5 = vadd.f32 1.0, %v1339_v2 }
 0x145   : > { %1352 = vrcp.f32 %v1019_v3  ;;  %v1020_v6 = vadd.f32 1.0, %v1341_v4 }
 0x146   : > { %1354 = vrcp.f32 %v1018_v5 }
 0x147   : > { %1356 = vrcp.f32 %v1020_v6 }
 0x14d   : > { %v1343_v7 = vpop.eup %1342 }
 0x14e   : > { %v1345_v9 = vpop.eup %1344  ;;  %1057 = vst [vmem:[%s1744_s18] sm:$0xff] %v1343_v7 }
 0x14f   : > { %v1347_v10 = vpop.eup %1346  ;;  %1059 = vst [vmem:[%s1744_s18 + $0x10] sm:$0xff] %v1345_v9  ;;  %v909_v11 = vpop.f32.mrf.mxu0 }
 0x150   : > { %v1349_v12 = vpop.eup %1348  ;;  %1058 = vst [vmem:[%s1744_s18 + $0x8] sm:$0xff] %v1347_v10  ;;  %v910_v13 = vadd.f32 %v909_v11, %v1730_v31  ;;  %v952_v14 = vpop.f32.mrf.mxu1 }
 0x151   : > { %v1351_v15 = vpop.eup %1350  ;;  %1060 = vst [vmem:[%s1744_s18 + $0x18] sm:$0xff] %v1349_v12  ;;  %v953_v16 = vadd.f32 %v952_v14, %v1730_v31  ;;  %v911_v17 = vpop.f32.mrf.mxu0 }
 0x152   : > { %v1353_v18 = vpop.eup %1352  ;;  %1065 = vst [vmem:[%s1744_s18 + $0x40] sm:$0xf] %v1351_v15  ;;  %v1276_v19 = vmul.f32 -1.442695, %v910_v13  ;;  %v912_v20 = vadd.f32 %v911_v17, %v1730_v31  ;;  %v954_v21 = vpop.f32.mrf.mxu1 }
 0x153   : > { %v1355_v22 = vpop.eup %1354  ;;  %1067 = vst [vmem:[%s1744_s18 + $0x50] sm:$0xf] %v1353_v18  ;;  %v1278_v23 = vmul.f32 -1.442695, %v953_v16  ;;  %v955_v24 = vadd.f32 %v954_v21, %v1730_v31  ;;  %v913_v25 = vpop.f32.mrf.mxu0 }
 0x154   : > { %v1357_v26 = vpop.eup %1356  ;;  %1066 = vst [vmem:[%s1744_s18 + $0x48] sm:$0xf] %v1355_v22  ;;  %1358 = vpow2.f32 %v1276_v19  ;;  %v1277_v27 = vmul.f32 -1.442695, %v912_v20  ;;  %v914_v28 = vadd.f32 %v913_v25, %v1734_v37  ;;  %v956_v30 = vpop.f32.mrf.mxu1 }
 0x155   : > { %1068 = vst [vmem:[%s1744_s18 + $0x58] sm:$0xf] %v1357_v26  ;;  %1360 = vpow2.f32 %v1278_v23  ;;  %v1279_v32 = vmul.f32 -1.442695, %v955_v24  ;;  %v957_v33 = vadd.f32 %v956_v30, %v1734_v37  ;;  %v915_v34 = vpop.f32.mrf.mxu0  ;;  %v1095_v63 = vld [vmem:[%s1744_s18] sm:$0xff] (%p1465_p5) }
 0x156   : > { %1362 = vpow2.f32 %v1277_v27  ;;  %v1284_v35 = vmul.f32 -1.442695, %v914_v28  ;;  %v916_v36 = vadd.f32 %v915_v34, %v1734_v37  ;;  %v958_v38 = vpop.f32.mrf.mxu1  ;;  %v1099_v1 = vld [vmem:[%s1744_s18 + $0x10] sm:$0xff] (%p1465_p5)  ;;  %1096 = vst [vmem:[%s1082_s20] sm:$0xff] (%p1465_p5), %v1095_v63 }
 0x157   : > { %1364 = vpow2.f32 %v1279_v32  ;;  %v1286_v31 = vmul.f32 -1.442695, %v957_v33  ;;  %v959_v39 = vadd.f32 %v958_v38, %v1734_v37  ;;  %v1097_v0 = vld [vmem:[%s1744_s18 + $0x8] sm:$0xff] (%p1465_p5)  ;;  %1100 = vst [vmem:[%s1082_s20 + $0x10] sm:$0xff] (%p1465_p5), %v1099_v1 }
 0x158   : > { %1366 = vpow2.f32 %v1284_v35  ;;  %v1285_v40 = vmul.f32 -1.442695, %v916_v36  ;;  %v1101_v2 = vld [vmem:[%s1744_s18 + $0x18] sm:$0xff] (%p1465_p5)  ;;  %1098 = vst [vmem:[%s1082_s20 + $0x8] sm:$0xff] (%p1465_p5), %v1097_v0 }
 0x159   : > { %1368 = vpow2.f32 %v1286_v31  ;;  %v1287_v41 = vmul.f32 -1.442695, %v959_v39  ;;  %1102 = vst [vmem:[%s1082_s20 + $0x18] sm:$0xff] (%p1465_p5), %v1101_v2  ;;  %v1111_v7 = vld [vmem:[%s1744_s18 + $0x40] sm:$0xff] (%p1465_p5) }
 0x15a   : > { %1370 = vpow2.f32 %v1285_v40  ;;  %1112 = vst [vmem:[%s1082_s20 + $0x80] sm:$0xff] (%p1465_p5), %v1111_v7  ;;  %v1115_v10 = vld [vmem:[%s1744_s18 + $0x50] sm:$0xff] (%p1465_p5) }
 0x15b   : > { %1372 = vpow2.f32 %v1287_v41  ;;  %v1113_v9 = vld [vmem:[%s1744_s18 + $0x48] sm:$0xff] (%p1465_p5)  ;;  %1116 = vst [vmem:[%s1082_s20 + $0x90] sm:$0xff] (%p1465_p5), %v1115_v10 }
 0x15c   : > { %v1117_v11 = vld [vmem:[%s1744_s18 + $0x58] sm:$0xff] (%p1465_p5)  ;;  %1114 = vst [vmem:[%s1082_s20 + $0x88] sm:$0xff] (%p1465_p5), %v1113_v9 }
 0x15d   : > { %1118 = vst [vmem:[%s1082_s20 + $0x98] sm:$0xff] (%p1465_p5), %v1117_v11 }
 0x161   : > { %v1359_v42 = vpop.eup %1358 }
 0x162   : > { %v1361_v43 = vpop.eup %1360  ;;  %v1013_v29 = vadd.f32 1.0, %v1359_v42 }
 0x163   : > { %v1363_v44 = vpop.eup %1362  ;;  %v1015_v45 = vadd.f32 1.0, %v1361_v43 }
 0x164   : > { %v1365_v46 = vpop.eup %1364  ;;  %1374 = vrcp.f32 %v1013_v29  ;;  %v1014_v47 = vadd.f32 1.0, %v1363_v44 }
 0x165   : > { %v1367_v48 = vpop.eup %1366  ;;  %1376 = vrcp.f32 %v1015_v45  ;;  %v1016_v49 = vadd.f32 1.0, %v1365_v46 }
 0x166   : > { %v1369_v50 = vpop.eup %1368  ;;  %1378 = vrcp.f32 %v1014_v47  ;;  %v1021_v37 = vadd.f32 1.0, %v1367_v48 }
 0x167   : > { %v1371_v51 = vpop.eup %1370  ;;  %1380 = vrcp.f32 %v1016_v49  ;;  %v1023_v52 = vadd.f32 1.0, %v1369_v50 }
 0x168   : > { %v1373_v53 = vpop.eup %1372  ;;  %1382 = vrcp.f32 %v1021_v37  ;;  %v1022_v54 = vadd.f32 1.0, %v1371_v51 }
 0x169   : > { %1384 = vrcp.f32 %v1023_v52  ;;  %v1024_v55 = vadd.f32 1.0, %v1373_v53 }
 0x16a   : > { %1386 = vrcp.f32 %v1022_v54 }
 0x16b   : > { %1388 = vrcp.f32 %v1024_v55 }
 0x171   : > { %v1375_v56 = vpop.eup %1374 }
 0x172   : > { %v1377_v8 = vpop.eup %1376  ;;  %1061 = vst [vmem:[%s1744_s18 + $0x20] sm:$0xff] %v1375_v56 }
 0x173   : > { %v1379_v57 = vpop.eup %1378  ;;  %1063 = vst [vmem:[%s1744_s18 + $0x30] sm:$0xff] %v1377_v8 }
 0x174   : > { %v1381_v58 = vpop.eup %1380  ;;  %1062 = vst [vmem:[%s1744_s18 + $0x28] sm:$0xff] %v1379_v57 }
 0x175   : > { %v1383_v59 = vpop.eup %1382  ;;  %1064 = vst [vmem:[%s1744_s18 + $0x38] sm:$0xff] %v1381_v58  ;;  %1079 = sbr.rel (!%p1465_p5) target bundleno = 386 (0x182), region = 59 }
 0x176   : > { %v1385_v60 = vpop.eup %1384  ;;  %1069 = vst [vmem:[%s1744_s18 + $0x60] sm:$0xf] %v1383_v59 }
 0x177   : > { %v1387_v61 = vpop.eup %1386  ;;  %1071 = vst [vmem:[%s1744_s18 + $0x70] sm:$0xf] %v1385_v60 }
 0x178   : > { %v1389_v62 = vpop.eup %1388  ;;  %1070 = vst [vmem:[%s1744_s18 + $0x68] sm:$0xf] %v1387_v61 }
 0x179   : > { %1072 = vst [vmem:[%s1744_s18 + $0x78] sm:$0xf] %v1389_v62  ;;  %v1103_v3 = vld [vmem:[%s1744_s18 + $0x20] sm:$0xff] (%p1465_p5) }
 0x17a   : > { %1104 = vst [vmem:[%s1082_s20 + $0x20] sm:$0xff] %v1103_v3  ;;  %v1107_v5 = vld [vmem:[%s1744_s18 + $0x30] sm:$0xff] }
 0x17b   : > { %v1105_v4 = vld [vmem:[%s1744_s18 + $0x28] sm:$0xff]  ;;  %1108 = vst [vmem:[%s1082_s20 + $0x30] sm:$0xff] %v1107_v5 }
 0x17c   : > { %1106 = vst [vmem:[%s1082_s20 + $0x28] sm:$0xff] %v1105_v4  ;;  %v1109_v6 = vld [vmem:[%s1744_s18 + $0x38] sm:$0xff] }
 0x17d   : > { %1110 = vst [vmem:[%s1082_s20 + $0x38] sm:$0xff] %v1109_v6  ;;  %v1119_v12 = vld [vmem:[%s1744_s18 + $0x60] sm:$0xff] }
 0x17e   : > { %v1123_v14 = vld [vmem:[%s1744_s18 + $0x70] sm:$0xff]  ;;  %1120 = vst [vmem:[%s1082_s20 + $0xa0] sm:$0xff] %v1119_v12 }
 0x17f   : > { %v1121_v13 = vld [vmem:[%s1744_s18 + $0x68] sm:$0xff]  ;;  %1124 = vst [vmem:[%s1082_s20 + $0xb0] sm:$0xff] %v1123_v14 }
 0x180   : > { %1122 = vst [vmem:[%s1082_s20 + $0xa8] sm:$0xff] %v1121_v13  ;;  %v1125_v15 = vld [vmem:[%s1744_s18 + $0x78] sm:$0xff] }
 0x181   : > { %1126 = vst [vmem:[%s1082_s20 + $0xb8] sm:$0xff] %v1125_v15 }
 0x182 PF: > { %p10_p10 = scmp.ge.s32.totalorder %s1452_s16, 4   ;;  %s1808_s12 = smov %s1408_s13 }
 0x183   : > { %s1809_s13 = smov %s1463_s19  ;;  %s1810_s14 = smov %s1452_s16 }
 0x184   :  { %12 = sbr.rel (!%p10_p10) target bundleno = 2 (0x2), region = 113 }

</bundles_post_ra>
